<compile_context>
chip_gen: v5e
topology: v5e:2x2
jax: 0.10.0
libtpu: 0.0.40
codegen_flags: <defaults>
</compile_context>

<pallas_src>
import math

import jax
import jax.numpy as jnp
from jax import lax
from jax.experimental import pallas as pl
from jax.experimental.pallas import tpu as pltpu


OUT_PAD = 128  # lane-dense padded fc output width (real logits = first 2 lanes)


# ----------------------------------------------------------------------------
# Pallas kernel: one chunk of Bc (sublane-aligned) batch elements per grid step.
# ----------------------------------------------------------------------------
def rvnn_kernel(
    h_ref,       # (NB, f_in)   bf16  node features, node-major rows (r = n*Bc + c)
    agg_ref,     # (NB, NB)     bf16  block-diagonal parent-aggregation operator
    w_emb_ref,   # (f_in, F)    bf16  emb weight (pre-transposed)
    w_rx_ref,    # (F, F)       bf16  x-side r gate
    w_zx_ref,    # (F, F)       bf16  x-side z gate
    w_cx_ref,    # (F, F)       bf16  x-side candidate
    b_r_ref,     # (1, F)       f32   b_rx + b_rh
    b_z_ref,     # (1, F)       f32   b_zx + b_zh
    b_c_ref,     # (1, F)       f32   b_cx + b_ch
    w_rh_ref,    # (F, F)       bf16  h-side r gate
    w_zh_ref,    # (F, F)       bf16  h-side z gate
    w_ch_ref,    # (F, F)       bf16  h-side candidate
    w_fc_ref,    # (F, OUT_PAD) f32   fc weight, zero-padded past column 2
    b_fc_ref,    # (1, OUT_PAD) f32
    y_ref,       # (Bc, OUT_PAD) f32  lane-dense output logits
    hcopy_ref,   # scratch (NB, F) bf16   h_e_copy (MXU operand)
    xr_ref,      # scratch (NB, F) f32    hoisted x-side r projection (+bias)
    xz_ref,      # scratch (NB, F) f32    hoisted x-side z projection (+bias)
    xc_ref,      # scratch (NB, F) f32    hoisted x-side c projection (+bias)
):
    f32 = jnp.float32
    bf16 = hcopy_ref.dtype
    NB = h_ref.shape[0]
    F = w_emb_ref.shape[1]
    Bc = y_ref.shape[0]
    N = NB // Bc

    # --- pre-loop: embedding + hoisted x-side GEMMs (single big-M matmuls) ----
    h_e = jnp.dot(h_ref[...], w_emb_ref[...], preferred_element_type=f32)   # (NB, F)
    hcopy_ref[...] = h_e.astype(bf16)
    h_e_b = h_e.astype(bf16)
    # Three separate lane-aligned gate slabs (no in-loop column slicing).
    xr_ref[...] = jnp.dot(h_e_b, w_rx_ref[...], preferred_element_type=f32) + b_r_ref[...]
    xz_ref[...] = jnp.dot(h_e_b, w_zx_ref[...], preferred_element_type=f32) + b_z_ref[...]
    xc_ref[...] = jnp.dot(h_e_b, w_cx_ref[...], preferred_element_type=f32) + b_c_ref[...]

    # --- sequential per-node GRU-style update, running node-max in the carry --
    def body(i, h_max):
        r0 = pl.multiple_of(i * Bc, Bc)

        # Parent aggregation for node i, all Bc batches, in ONE bf16 MXU matmul:
        #   x_p[c, :] = sum_m adj_norm[batch c, i, m] * hcopy[batch c, node m, :]
        a_i = agg_ref[pl.ds(r0, Bc), :]                                      # (Bc, NB)
        x_p = jnp.dot(a_i, hcopy_ref[...], preferred_element_type=f32)       # (Bc, F)
        x_p_b = x_p.astype(bf16)

        hr = jnp.dot(x_p_b, w_rh_ref[...], preferred_element_type=f32)       # (Bc, F)
        hz = jnp.dot(x_p_b, w_zh_ref[...], preferred_element_type=f32)       # (Bc, F)

        # Gate math stays in f32 (v5e has no bf16 VPU/EUP).
        r = jax.nn.sigmoid(xr_ref[pl.ds(r0, Bc), :] + hr)
        z = jax.nn.sigmoid(xz_ref[pl.ds(r0, Bc), :] + hz)
        hc = jnp.tanh(
            xc_ref[pl.ds(r0, Bc), :]
            + jnp.dot((r * x_p).astype(bf16), w_ch_ref[...],
                      preferred_element_type=f32))
        h_new = z * x_p + (1.0 - z) * hc                                     # (Bc, F) f32

        hcopy_ref[pl.ds(r0, Bc), :] = h_new.astype(bf16)
        # Every node row gets overwritten (loop runs over all N nodes), so the
        # final max over nodes is exactly the running max over h_new.
        return jnp.maximum(h_max, h_new)

    unroll = True if N <= 32 else 4  # serially dependent: full unroll past ~32 only bloats code
    h_max = lax.fori_loop(0, N, body,
                          jnp.full((Bc, F), -jnp.inf, f32), unroll=unroll)

    # --- lane-dense fc epilogue in f32 (first 2 lanes are the real logits) ----
    y_ref[...] = (jnp.dot(h_max, w_fc_ref[...], preferred_element_type=f32)
                  + b_fc_ref[...])


# ----------------------------------------------------------------------------
# Chunking heuristic: sublane-aligned Bc, prefer a single grid step.
# ----------------------------------------------------------------------------
def _choose_chunk(batch):
    Bp = ((batch + 7) // 8) * 8          # pad batch to a sublane multiple
    if Bp <= 16:
        return Bp, Bp                    # whole (padded) batch in one grid step
    # Cap Bc at 16 so the block-diag agg operand stays modest; prefer an even
    # number of grid steps so v7x's two TensorCores stay balanced.
    for bc in (16, 8):
        if Bp % bc == 0 and (Bp // bc) % 2 == 0:
            return Bp, bc
    return Bp, 8


# ----------------------------------------------------------------------------
# Wrapper: parameter fusion / flattening + pallas_call
# ----------------------------------------------------------------------------
def rvnn_td_forward(h, adj, params, block_b=None):
    B, N, f_in = h.shape
    F = params["w_emb"].shape[0]
    f32, bf16 = jnp.float32, jnp.bfloat16

    if block_b is None:
        Bp, Bc = _choose_chunk(B)
    else:
        Bc = block_b
        Bp = ((B + Bc - 1) // Bc) * Bc
    G = Bp // Bc
    NB = N * Bc

    # Zero-pad the batch (padded rows produce finite garbage, sliced off below).
    if Bp != B:
        pad = Bp - B
        h = jnp.concatenate([h, jnp.zeros((pad, N, f_in), h.dtype)], axis=0)
        adj = jnp.concatenate([adj, jnp.zeros((pad, N, N), adj.dtype)], axis=0)

    # Row-normalized transposed adjacency, computed in f32 (pure input prep):
    #   adj_norm[b, i, j] = adj[b, j, i] / sum_k adj[b, i, k]   (0 if row sum is 0)
    d = jnp.sum(adj.astype(f32), axis=-1)
    d_inv = jnp.where(d != 0, 1.0 / jnp.where(d != 0, d, 1.0), 0.0)
    adj_norm = (jnp.transpose(adj.astype(f32), (0, 2, 1)) * d_inv[..., None])

    # Node-major flattening per batch chunk: flat row r = n * Bc + c.  bf16 DMA.
    h_flat = (
        h.astype(f32)
        .reshape(G, Bc, N, f_in)
        .transpose(0, 2, 1, 3)
        .reshape(G, NB, f_in)
    ).astype(bf16)

    # Block-diagonal aggregation operator so the per-node parent aggregation of
    # all Bc batches is a single (Bc, NB) @ (NB, F) MXU matmul in the kernel:
    #   agg[g, n*Bc + c, m*Bc + c'] = adj_norm[g*Bc + c, n, m] * (c == c')
    adjn_g = adj_norm.reshape(G, Bc, N, N)
    eye = jnp.eye(Bc, dtype=f32)
    agg = jnp.einsum("gcnm,cd->gncmd", adjn_g, eye).reshape(G, NB, NB).astype(bf16)

    # Pre-transposed per-gate weights (bf16 MXU operands), biases pre-summed (f32).
    w_emb_t = params["w_emb"].T.astype(bf16)                         # (f_in, F)
    w_ioux_t = params["w_ioux"].T.astype(f32)                        # (F, 2F) cols [r | z]
    w_iouh_t = params["w_iouh"].T.astype(f32)                        # (F, 2F) cols [r | z]
    w_rx = w_ioux_t[:, :F].astype(bf16)
    w_zx = w_ioux_t[:, F:].astype(bf16)
    w_cx = params["w_coux"].T.astype(bf16)
    w_rh = w_iouh_t[:, :F].astype(bf16)
    w_zh = w_iouh_t[:, F:].astype(bf16)
    w_ch = params["w_couh"].T.astype(bf16)
    b_r = (params["b_ioux"][:F] + params["b_iouh"][:F]).astype(f32).reshape(1, F)
    b_z = (params["b_ioux"][F:] + params["b_iouh"][F:]).astype(f32).reshape(1, F)
    b_c = (params["b_coux"] + params["b_couh"]).astype(f32).reshape(1, F)
    w_fc_pad = jnp.zeros((F, OUT_PAD), f32).at[:, :2].set(params["w_fc"].T.astype(f32))
    b_fc_pad = jnp.zeros((1, OUT_PAD), f32).at[0, :2].set(params["b_fc"].astype(f32))

    weights = [w_emb_t, w_rx, w_zx, w_cx, b_r, b_z, b_c,
               w_rh, w_zh, w_ch, w_fc_pad, b_fc_pad]

    # NOTE: with G=1 (the common case here) the constant weights are fetched
    # once; at G>1 on v7x consider pipeline_mode=pl.Buffered(1) on these specs
    # to avoid double-buffering never-changing operands.
    in_specs = [
        pl.BlockSpec((None, NB, f_in), lambda g: (g, 0, 0)),         # h_flat chunk
        pl.BlockSpec((None, NB, NB), lambda g: (g, 0, 0)),           # agg chunk
    ] + [pl.BlockSpec(w.shape, lambda g: (0, 0)) for w in weights]   # all weights 2-D

    # Explicit VMEM budget (matters on v7x: 64 MiB physical, 32 MiB default scoped).
    def nbytes(x):
        return int(x.size) * x.dtype.itemsize
    chunk_in = nbytes(h_flat) // G + nbytes(agg) // G
    w_bytes = sum(nbytes(w) for w in weights)
    scratch_bytes = NB * F * (2 + 3 * 4)          # bf16 hcopy + 3x f32 gate slabs
    out_bytes = Bc * OUT_PAD * 4
    vmem_limit = int(min(max(2 * (chunk_in + w_bytes + out_bytes)
                             + scratch_bytes + (4 << 20), 16 << 20), 48 << 20))

    out = pl.pallas_call(
        rvnn_kernel,
        out_shape=jax.ShapeDtypeStruct((G, Bc, OUT_PAD), f32),
        grid=(G,),
        in_specs=in_specs,
        out_specs=pl.BlockSpec((None, Bc, OUT_PAD), lambda g: (g, 0, 0)),
        scratch_shapes=[
            pltpu.VMEM((NB, F), bf16),     # hcopy_ref
            pltpu.VMEM((NB, F), f32),      # xr_ref
            pltpu.VMEM((NB, F), f32),      # xz_ref
            pltpu.VMEM((NB, F), f32),      # xc_ref
        ],
        compiler_params=pltpu.CompilerParams(
            # Batch chunks are independent -> shard grid steps across both
            # TensorCores on v7x (harmless no-op on v5e/v6e single-TC chips).
            dimension_semantics=("parallel",),
            vmem_limit_bytes=vmem_limit,
        ),
    )(h_flat, agg, *weights)

    # Logits are the first 2 lanes; drop the batch padding rows.
    return out.reshape(Bp, OUT_PAD)[:B, :2]


# ----------------------------------------------------------------------------
# Pure-JAX reference (mirrors the PyTorch forward exactly) for validation.
# ----------------------------------------------------------------------------
def _tree_parent_agg(h, adj):
    d = jnp.sum(adj, axis=-1)
    d_inv = jnp.where(d != 0, 1.0 / jnp.where(d != 0, d, 1.0), 0.0)
    adj_t = jnp.transpose(adj, (0, 2, 1)) * d_inv[..., None]
    return jnp.matmul(adj_t, h)


def rvnn_td_reference(h, adj, params):
    h_e = h @ params["w_emb"].T
    h_parent = _tree_parent_agg(h_e, adj)
    h_copy = h_e
    N = h.shape[1]
    f_out = params["w_emb"].shape[0]
    for i in range(N):
        x = h_e[:, i, :]
        xp = h_parent[:, i, :]
        iou = (x @ params["w_ioux"].T + params["b_ioux"]
               + xp @ params["w_iouh"].T + params["b_iouh"])
        r, z = iou[:, :f_out], iou[:, f_out:]
        r, z = jax.nn.sigmoid(r), jax.nn.sigmoid(z)
        hc = jnp.tanh(x @ params["w_coux"].T + params["b_coux"]
                      + (r * xp) @ params["w_couh"].T + params["b_couh"])
        h_new = z * xp + (1.0 - z) * hc
        h_copy = h_copy.at[:, i, :].set(h_new)
        h_parent = _tree_parent_agg(h_copy, adj)
    h_max = jnp.max(h_copy, axis=1)
    return h_max @ params["w_fc"].T + params["b_fc"]


# ----------------------------------------------------------------------------
# Deterministic parameter / input construction + run
# ----------------------------------------------------------------------------
def _linear_params(key, out_f, in_f, bias=True):
    kw, kb = jax.random.split(key)
    bound = 1.0 / math.sqrt(in_f)
    w = jax.random.uniform(kw, (out_f, in_f), jnp.float32, -bound, bound)
    if not bias:
        return w, None
    b = jax.random.uniform(kb, (out_f,), jnp.float32, -bound, bound)
    return w, b


if __name__ == "__main__":
    B, N, F_IN, F_OUT = 4, 8, 16, 32

    key = jax.random.PRNGKey(0)
    k_h, k_adj, k_p = jax.random.split(key, 3)

    h = jax.random.normal(k_h, (B, N, F_IN), jnp.float32)
    adj = jax.random.bernoulli(k_adj, 0.3, (B, N, N)).astype(jnp.float32)

    pkeys = jax.random.split(k_p, 6)
    w_emb, _ = _linear_params(pkeys[0], F_OUT, F_IN, bias=False)
    w_ioux, b_ioux = _linear_params(pkeys[1], 2 * F_OUT, F_OUT)
    w_iouh, b_iouh = _linear_params(pkeys[2], 2 * F_OUT, F_OUT)
    w_coux, b_coux = _linear_params(pkeys[3], F_OUT, F_OUT)
    w_couh, b_couh = _linear_params(pkeys[4], F_OUT, F_OUT)
    w_fc, b_fc = _linear_params(pkeys[5], 2, F_OUT)

    params = dict(
        w_emb=w_emb,
        w_ioux=w_ioux, b_ioux=b_ioux,
        w_iouh=w_iouh, b_iouh=b_iouh,
        w_coux=w_coux, b_coux=b_coux,
        w_couh=w_couh, b_couh=b_couh,
        w_fc=w_fc, b_fc=b_fc,
    )

    y = rvnn_td_forward(h, adj, params)
    y = jax.block_until_ready(y)

    y_ref = jax.block_until_ready(rvnn_td_reference(h, adj, params))
    assert y.shape == (B, 2)
    # Tolerance sized for the bf16 storage / bf16 MXU dataflow (per perf review);
    # gate math, adjacency normalization and the fc epilogue remain f32.
    assert jnp.allclose(y, y_ref, rtol=5e-2, atol=5e-2), (y, y_ref)

    print("KERNEL_OK")
</pallas_src>

<mosaic_0001>
module attributes {stable_mosaic.version = 11 : i64} {
  func.func @rvnn_kernel(%arg0: i32, %arg1: memref<1x64x16xbf16, #tpu.memory_space<vmem>>, %arg2: memref<1x64x64xbf16, #tpu.memory_space<vmem>>, %arg3: memref<16x32xbf16, #tpu.memory_space<vmem>>, %arg4: memref<32x32xbf16, #tpu.memory_space<vmem>>, %arg5: memref<32x32xbf16, #tpu.memory_space<vmem>>, %arg6: memref<32x32xbf16, #tpu.memory_space<vmem>>, %arg7: memref<1x32xf32, #tpu.memory_space<vmem>>, %arg8: memref<1x32xf32, #tpu.memory_space<vmem>>, %arg9: memref<1x32xf32, #tpu.memory_space<vmem>>, %arg10: memref<32x32xbf16, #tpu.memory_space<vmem>>, %arg11: memref<32x32xbf16, #tpu.memory_space<vmem>>, %arg12: memref<32x32xbf16, #tpu.memory_space<vmem>>, %arg13: memref<32x128xf32, #tpu.memory_space<vmem>>, %arg14: memref<1x128xf32, #tpu.memory_space<vmem>>, %arg15: memref<1x8x128xf32, #tpu.memory_space<vmem>>, %arg16: memref<64x32xbf16, #tpu.memory_space<vmem>>, %arg17: memref<64x32xf32, #tpu.memory_space<vmem>>, %arg18: memref<64x32xf32, #tpu.memory_space<vmem>>, %arg19: memref<64x32xf32, #tpu.memory_space<vmem>>) attributes {dimension_semantics = [#tpu.dimension_semantics<parallel>], iteration_bounds = array<i64: 1>, scalar_prefetch = 0 : i64, scratch_operands = 4 : i64, tpu.core_type = #tpu.core_type<tc>, window_params = [{transform_indices = @transform_0, window_bounds = array<i64: 1, 64, 16>}, {transform_indices = @transform_1, window_bounds = array<i64: 1, 64, 64>}, {pipeline_mode = #tpu.pipeline_mode<synchronous>, transform_indices = @transform_2, window_bounds = array<i64: 16, 32>}, {pipeline_mode = #tpu.pipeline_mode<synchronous>, transform_indices = @transform_3, window_bounds = array<i64: 32, 32>}, {pipeline_mode = #tpu.pipeline_mode<synchronous>, transform_indices = @transform_4, window_bounds = array<i64: 32, 32>}, {pipeline_mode = #tpu.pipeline_mode<synchronous>, transform_indices = @transform_5, window_bounds = array<i64: 32, 32>}, {pipeline_mode = #tpu.pipeline_mode<synchronous>, transform_indices = @transform_6, window_bounds = array<i64: 1, 32>}, {pipeline_mode = #tpu.pipeline_mode<synchronous>, transform_indices = @transform_7, window_bounds = array<i64: 1, 32>}, {pipeline_mode = #tpu.pipeline_mode<synchronous>, transform_indices = @transform_8, window_bounds = array<i64: 1, 32>}, {pipeline_mode = #tpu.pipeline_mode<synchronous>, transform_indices = @transform_9, window_bounds = array<i64: 32, 32>}, {pipeline_mode = #tpu.pipeline_mode<synchronous>, transform_indices = @transform_10, window_bounds = array<i64: 32, 32>}, {pipeline_mode = #tpu.pipeline_mode<synchronous>, transform_indices = @transform_11, window_bounds = array<i64: 32, 32>}, {pipeline_mode = #tpu.pipeline_mode<synchronous>, transform_indices = @transform_12, window_bounds = array<i64: 32, 128>}, {pipeline_mode = #tpu.pipeline_mode<synchronous>, transform_indices = @transform_13, window_bounds = array<i64: 1, 128>}, {transform_indices = @transform_14, window_bounds = array<i64: 1, 8, 128>}]} {
    %c0 = arith.constant 0 : index
    %c0_0 = arith.constant 0 : index
    %c0_1 = arith.constant 0 : index
    %0 = vector.load %arg1[%c0, %c0_0, %c0_1] : memref<1x64x16xbf16, #tpu.memory_space<vmem>>, vector<1x64x16xbf16>
    %1 = vector.shape_cast %0 : vector<1x64x16xbf16> to vector<64x16xbf16>
    %c0_2 = arith.constant 0 : index
    %c0_3 = arith.constant 0 : index
    %2 = vector.load %arg3[%c0_2, %c0_3] : memref<16x32xbf16, #tpu.memory_space<vmem>>, vector<16x32xbf16>
    %cst = arith.constant dense<0.000000e+00> : vector<64x32xf32>
    %3 = tpu.matmul %1, %2, %cst {dimension_numbers = #tpu.dot_dimension_numbers<[1], [0], [0], [1], [0, 0, 1, 1], [], []>} : vector<64x16xbf16>, vector<16x32xbf16>, vector<64x32xf32> -> vector<64x32xf32>
    %4 = arith.truncf %3 : vector<64x32xf32> to vector<64x32xbf16>
    %c0_4 = arith.constant 0 : index
    %c0_5 = arith.constant 0 : index
    %5 = vector.load %arg16[%c0_4, %c0_5] : memref<64x32xbf16, #tpu.memory_space<vmem>>, vector<64x32xbf16>
    tpu.vector_store %arg16[%c0_4, %c0_5], %4 {strides = array<i32>} : memref<64x32xbf16, #tpu.memory_space<vmem>>, vector<64x32xbf16>,
    %6 = arith.truncf %3 : vector<64x32xf32> to vector<64x32xbf16>
    %c0_6 = arith.constant 0 : index
    %c0_7 = arith.constant 0 : index
    %7 = vector.load %arg4[%c0_6, %c0_7] : memref<32x32xbf16, #tpu.memory_space<vmem>>, vector<32x32xbf16>
    %cst_8 = arith.constant dense<0.000000e+00> : vector<64x32xf32>
    %8 = tpu.matmul %6, %7, %cst_8 {dimension_numbers = #tpu.dot_dimension_numbers<[1], [0], [0], [1], [0, 0, 1, 1], [], []>} : vector<64x32xbf16>, vector<32x32xbf16>, vector<64x32xf32> -> vector<64x32xf32>
    %c0_9 = arith.constant 0 : index
    %c0_10 = arith.constant 0 : index
    %9 = vector.load %arg7[%c0_9, %c0_10] : memref<1x32xf32, #tpu.memory_space<vmem>>, vector<1x32xf32>
    %10 = vector.broadcast %9 : vector<1x32xf32> to vector<64x32xf32>
    %11 = arith.addf %8, %10 : vector<64x32xf32>
    %c0_11 = arith.constant 0 : index
    %c0_12 = arith.constant 0 : index
    %12 = vector.load %arg17[%c0_11, %c0_12] : memref<64x32xf32, #tpu.memory_space<vmem>>, vector<64x32xf32>
    tpu.vector_store %arg17[%c0_11, %c0_12], %11 {strides = array<i32>} : memref<64x32xf32, #tpu.memory_space<vmem>>, vector<64x32xf32>,
    %c0_13 = arith.constant 0 : index
    %c0_14 = arith.constant 0 : index
    %13 = vector.load %arg5[%c0_13, %c0_14] : memref<32x32xbf16, #tpu.memory_space<vmem>>, vector<32x32xbf16>
    %cst_15 = arith.constant dense<0.000000e+00> : vector<64x32xf32>
    %14 = tpu.matmul %6, %13, %cst_15 {dimension_numbers = #tpu.dot_dimension_numbers<[1], [0], [0], [1], [0, 0, 1, 1], [], []>} : vector<64x32xbf16>, vector<32x32xbf16>, vector<64x32xf32> -> vector<64x32xf32>
    %c0_16 = arith.constant 0 : index
    %c0_17 = arith.constant 0 : index
    %15 = vector.load %arg8[%c0_16, %c0_17] : memref<1x32xf32, #tpu.memory_space<vmem>>, vector<1x32xf32>
    %16 = vector.broadcast %15 : vector<1x32xf32> to vector<64x32xf32>
    %17 = arith.addf %14, %16 : vector<64x32xf32>
    %c0_18 = arith.constant 0 : index
    %c0_19 = arith.constant 0 : index
    %18 = vector.load %arg18[%c0_18, %c0_19] : memref<64x32xf32, #tpu.memory_space<vmem>>, vector<64x32xf32>
    tpu.vector_store %arg18[%c0_18, %c0_19], %17 {strides = array<i32>} : memref<64x32xf32, #tpu.memory_space<vmem>>, vector<64x32xf32>,
    %c0_20 = arith.constant 0 : index
    %c0_21 = arith.constant 0 : index
    %19 = vector.load %arg6[%c0_20, %c0_21] : memref<32x32xbf16, #tpu.memory_space<vmem>>, vector<32x32xbf16>
    %cst_22 = arith.constant dense<0.000000e+00> : vector<64x32xf32>
    %20 = tpu.matmul %6, %19, %cst_22 {dimension_numbers = #tpu.dot_dimension_numbers<[1], [0], [0], [1], [0, 0, 1, 1], [], []>} : vector<64x32xbf16>, vector<32x32xbf16>, vector<64x32xf32> -> vector<64x32xf32>
    %c0_23 = arith.constant 0 : index
    %c0_24 = arith.constant 0 : index
    %21 = vector.load %arg9[%c0_23, %c0_24] : memref<1x32xf32, #tpu.memory_space<vmem>>, vector<1x32xf32>
    %22 = vector.broadcast %21 : vector<1x32xf32> to vector<64x32xf32>
    %23 = arith.addf %20, %22 : vector<64x32xf32>
    %c0_25 = arith.constant 0 : index
    %c0_26 = arith.constant 0 : index
    %24 = vector.load %arg19[%c0_25, %c0_26] : memref<64x32xf32, #tpu.memory_space<vmem>>, vector<64x32xf32>
    tpu.vector_store %arg19[%c0_25, %c0_26], %23 {strides = array<i32>} : memref<64x32xf32, #tpu.memory_space<vmem>>, vector<64x32xf32>,
    %cst_27 = arith.constant 0xFF800000 : f32
    %25 = vector.broadcast %cst_27 : f32 to vector<8x32xf32>
    %c0_i32 = arith.constant 0 : i32
    %c8_i32 = arith.constant 8 : i32
    %26 = arith.muli %c0_i32, %c8_i32 : i32
    %27 = tpu.assume_multiple %26, 8 : i32
    %c0_28 = arith.constant 0 : index
    %28 = arith.index_cast %27 : i32 to index
    %c0_29 = arith.constant 0 : index
    %29 = vector.load %arg2[%c0_28, %28, %c0_29] : memref<1x64x64xbf16, #tpu.memory_space<vmem>>, vector<1x8x64xbf16>
    %30 = vector.shape_cast %29 : vector<1x8x64xbf16> to vector<8x64xbf16>
    %c0_30 = arith.constant 0 : index
    %c0_31 = arith.constant 0 : index
    %31 = vector.load %arg16[%c0_30, %c0_31] : memref<64x32xbf16, #tpu.memory_space<vmem>>, vector<64x32xbf16>
    %cst_32 = arith.constant dense<0.000000e+00> : vector<8x32xf32>
    %32 = tpu.matmul %30, %31, %cst_32 {dimension_numbers = #tpu.dot_dimension_numbers<[1], [0], [0], [1], [0, 0, 1, 1], [], []>} : vector<8x64xbf16>, vector<64x32xbf16>, vector<8x32xf32> -> vector<8x32xf32>
    %33 = arith.truncf %32 : vector<8x32xf32> to vector<8x32xbf16>
    %c0_33 = arith.constant 0 : index
    %c0_34 = arith.constant 0 : index
    %34 = vector.load %arg10[%c0_33, %c0_34] : memref<32x32xbf16, #tpu.memory_space<vmem>>, vector<32x32xbf16>
    %cst_35 = arith.constant dense<0.000000e+00> : vector<8x32xf32>
    %35 = tpu.matmul %33, %34, %cst_35 {dimension_numbers = #tpu.dot_dimension_numbers<[1], [0], [0], [1], [0, 0, 1, 1], [], []>} : vector<8x32xbf16>, vector<32x32xbf16>, vector<8x32xf32> -> vector<8x32xf32>
    %c0_36 = arith.constant 0 : index
    %c0_37 = arith.constant 0 : index
    %36 = vector.load %arg11[%c0_36, %c0_37] : memref<32x32xbf16, #tpu.memory_space<vmem>>, vector<32x32xbf16>
    %cst_38 = arith.constant dense<0.000000e+00> : vector<8x32xf32>
    %37 = tpu.matmul %33, %36, %cst_38 {dimension_numbers = #tpu.dot_dimension_numbers<[1], [0], [0], [1], [0, 0, 1, 1], [], []>} : vector<8x32xbf16>, vector<32x32xbf16>, vector<8x32xf32> -> vector<8x32xf32>
    %38 = arith.index_cast %27 : i32 to index
    %c0_39 = arith.constant 0 : index
    %39 = vector.load %arg17[%38, %c0_39] : memref<64x32xf32, #tpu.memory_space<vmem>>, vector<8x32xf32>
    %40 = arith.addf %39, %35 : vector<8x32xf32>
    %41 = arith.negf %40 : vector<8x32xf32>
    %42 = math.exp %41 : vector<8x32xf32>
    %cst_40 = arith.constant 1.000000e+00 : f32
    %43 = vector.broadcast %cst_40 : f32 to vector<8x32xf32>
    %44 = arith.addf %43, %42 : vector<8x32xf32>
    %45 = arith.divf %43, %44 : vector<8x32xf32>
    %46 = arith.index_cast %27 : i32 to index
    %c0_41 = arith.constant 0 : index
    %47 = vector.load %arg18[%46, %c0_41] : memref<64x32xf32, #tpu.memory_space<vmem>>, vector<8x32xf32>
    %48 = arith.addf %47, %37 : vector<8x32xf32>
    %49 = arith.negf %48 : vector<8x32xf32>
    %50 = math.exp %49 : vector<8x32xf32>
    %cst_42 = arith.constant 1.000000e+00 : f32
    %51 = vector.broadcast %cst_42 : f32 to vector<8x32xf32>
    %52 = arith.addf %51, %50 : vector<8x32xf32>
    %53 = arith.divf %51, %52 : vector<8x32xf32>
    %54 = arith.index_cast %27 : i32 to index
    %c0_43 = arith.constant 0 : index
    %55 = vector.load %arg19[%54, %c0_43] : memref<64x32xf32, #tpu.memory_space<vmem>>, vector<8x32xf32>
    %56 = arith.mulf %45, %32 : vector<8x32xf32>
    %57 = arith.truncf %56 : vector<8x32xf32> to vector<8x32xbf16>
    %c0_44 = arith.constant 0 : index
    %c0_45 = arith.constant 0 : index
    %58 = vector.load %arg12[%c0_44, %c0_45] : memref<32x32xbf16, #tpu.memory_space<vmem>>, vector<32x32xbf16>
    %cst_46 = arith.constant dense<0.000000e+00> : vector<8x32xf32>
    %59 = tpu.matmul %57, %58, %cst_46 {dimension_numbers = #tpu.dot_dimension_numbers<[1], [0], [0], [1], [0, 0, 1, 1], [], []>} : vector<8x32xbf16>, vector<32x32xbf16>, vector<8x32xf32> -> vector<8x32xf32>
    %60 = arith.addf %55, %59 : vector<8x32xf32>
    %61 = math.tanh %60 : vector<8x32xf32>
    %62 = arith.mulf %53, %32 : vector<8x32xf32>
    %cst_47 = arith.constant 1.000000e+00 : f32
    %63 = vector.broadcast %cst_47 : f32 to vector<8x32xf32>
    %64 = arith.subf %63, %53 : vector<8x32xf32>
    %65 = arith.mulf %64, %61 : vector<8x32xf32>
    %66 = arith.addf %62, %65 : vector<8x32xf32>
    %67 = arith.truncf %66 : vector<8x32xf32> to vector<8x32xbf16>
    %68 = arith.index_cast %27 : i32 to index
    %c0_48 = arith.constant 0 : index
    %69 = vector.load %arg16[%68, %c0_48] : memref<64x32xbf16, #tpu.memory_space<vmem>>, vector<8x32xbf16>
    tpu.vector_store %arg16[%68, %c0_48], %67 {strides = array<i32>} : memref<64x32xbf16, #tpu.memory_space<vmem>>, vector<8x32xbf16>,
    %70 = arith.maximumf %25, %66 : vector<8x32xf32>
    %c1_i32 = arith.constant 1 : i32
    %c8_i32_49 = arith.constant 8 : i32
    %71 = arith.muli %c1_i32, %c8_i32_49 : i32
    %72 = tpu.assume_multiple %71, 8 : i32
    %c0_50 = arith.constant 0 : index
    %73 = arith.index_cast %72 : i32 to index
    %c0_51 = arith.constant 0 : index
    %74 = vector.load %arg2[%c0_50, %73, %c0_51] : memref<1x64x64xbf16, #tpu.memory_space<vmem>>, vector<1x8x64xbf16>
    %75 = vector.shape_cast %74 : vector<1x8x64xbf16> to vector<8x64xbf16>
    %c0_52 = arith.constant 0 : index
    %c0_53 = arith.constant 0 : index
    %76 = vector.load %arg16[%c0_52, %c0_53] : memref<64x32xbf16, #tpu.memory_space<vmem>>, vector<64x32xbf16>
    %cst_54 = arith.constant dense<0.000000e+00> : vector<8x32xf32>
    %77 = tpu.matmul %75, %76, %cst_54 {dimension_numbers = #tpu.dot_dimension_numbers<[1], [0], [0], [1], [0, 0, 1, 1], [], []>} : vector<8x64xbf16>, vector<64x32xbf16>, vector<8x32xf32> -> vector<8x32xf32>
    %78 = arith.truncf %77 : vector<8x32xf32> to vector<8x32xbf16>
    %c0_55 = arith.constant 0 : index
    %c0_56 = arith.constant 0 : index
    %79 = vector.load %arg10[%c0_55, %c0_56] : memref<32x32xbf16, #tpu.memory_space<vmem>>, vector<32x32xbf16>
    %cst_57 = arith.constant dense<0.000000e+00> : vector<8x32xf32>
    %80 = tpu.matmul %78, %79, %cst_57 {dimension_numbers = #tpu.dot_dimension_numbers<[1], [0], [0], [1], [0, 0, 1, 1], [], []>} : vector<8x32xbf16>, vector<32x32xbf16>, vector<8x32xf32> -> vector<8x32xf32>
    %c0_58 = arith.constant 0 : index
    %c0_59 = arith.constant 0 : index
    %81 = vector.load %arg11[%c0_58, %c0_59] : memref<32x32xbf16, #tpu.memory_space<vmem>>, vector<32x32xbf16>
    %cst_60 = arith.constant dense<0.000000e+00> : vector<8x32xf32>
    %82 = tpu.matmul %78, %81, %cst_60 {dimension_numbers = #tpu.dot_dimension_numbers<[1], [0], [0], [1], [0, 0, 1, 1], [], []>} : vector<8x32xbf16>, vector<32x32xbf16>, vector<8x32xf32> -> vector<8x32xf32>
    %83 = arith.index_cast %72 : i32 to index
    %c0_61 = arith.constant 0 : index
    %84 = vector.load %arg17[%83, %c0_61] : memref<64x32xf32, #tpu.memory_space<vmem>>, vector<8x32xf32>
    %85 = arith.addf %84, %80 : vector<8x32xf32>
    %86 = arith.negf %85 : vector<8x32xf32>
    %87 = math.exp %86 : vector<8x32xf32>
    %cst_62 = arith.constant 1.000000e+00 : f32
    %88 = vector.broadcast %cst_62 : f32 to vector<8x32xf32>
    %89 = arith.addf %88, %87 : vector<8x32xf32>
    %90 = arith.divf %88, %89 : vector<8x32xf32>
    %91 = arith.index_cast %72 : i32 to index
    %c0_63 = arith.constant 0 : index
    %92 = vector.load %arg18[%91, %c0_63] : memref<64x32xf32, #tpu.memory_space<vmem>>, vector<8x32xf32>
    %93 = arith.addf %92, %82 : vector<8x32xf32>
    %94 = arith.negf %93 : vector<8x32xf32>
    %95 = math.exp %94 : vector<8x32xf32>
    %cst_64 = arith.constant 1.000000e+00 : f32
    %96 = vector.broadcast %cst_64 : f32 to vector<8x32xf32>
    %97 = arith.addf %96, %95 : vector<8x32xf32>
    %98 = arith.divf %96, %97 : vector<8x32xf32>
    %99 = arith.index_cast %72 : i32 to index
    %c0_65 = arith.constant 0 : index
    %100 = vector.load %arg19[%99, %c0_65] : memref<64x32xf32, #tpu.memory_space<vmem>>, vector<8x32xf32>
    %101 = arith.mulf %90, %77 : vector<8x32xf32>
    %102 = arith.truncf %101 : vector<8x32xf32> to vector<8x32xbf16>
    %c0_66 = arith.constant 0 : index
    %c0_67 = arith.constant 0 : index
    %103 = vector.load %arg12[%c0_66, %c0_67] : memref<32x32xbf16, #tpu.memory_space<vmem>>, vector<32x32xbf16>
    %cst_68 = arith.constant dense<0.000000e+00> : vector<8x32xf32>
    %104 = tpu.matmul %102, %103, %cst_68 {dimension_numbers = #tpu.dot_dimension_numbers<[1], [0], [0], [1], [0, 0, 1, 1], [], []>} : vector<8x32xbf16>, vector<32x32xbf16>, vector<8x32xf32> -> vector<8x32xf32>
    %105 = arith.addf %100, %104 : vector<8x32xf32>
    %106 = math.tanh %105 : vector<8x32xf32>
    %107 = arith.mulf %98, %77 : vector<8x32xf32>
    %cst_69 = arith.constant 1.000000e+00 : f32
    %108 = vector.broadcast %cst_69 : f32 to vector<8x32xf32>
    %109 = arith.subf %108, %98 : vector<8x32xf32>
    %110 = arith.mulf %109, %106 : vector<8x32xf32>
    %111 = arith.addf %107, %110 : vector<8x32xf32>
    %112 = arith.truncf %111 : vector<8x32xf32> to vector<8x32xbf16>
    %113 = arith.index_cast %72 : i32 to index
    %c0_70 = arith.constant 0 : index
    %114 = vector.load %arg16[%113, %c0_70] : memref<64x32xbf16, #tpu.memory_space<vmem>>, vector<8x32xbf16>
    tpu.vector_store %arg16[%113, %c0_70], %112 {strides = array<i32>} : memref<64x32xbf16, #tpu.memory_space<vmem>>, vector<8x32xbf16>,
    %115 = arith.maximumf %70, %111 : vector<8x32xf32>
    %c2_i32 = arith.constant 2 : i32
    %c8_i32_71 = arith.constant 8 : i32
    %116 = arith.muli %c2_i32, %c8_i32_71 : i32
    %117 = tpu.assume_multiple %116, 8 : i32
    %c0_72 = arith.constant 0 : index
    %118 = arith.index_cast %117 : i32 to index
    %c0_73 = arith.constant 0 : index
    %119 = vector.load %arg2[%c0_72, %118, %c0_73] : memref<1x64x64xbf16, #tpu.memory_space<vmem>>, vector<1x8x64xbf16>
    %120 = vector.shape_cast %119 : vector<1x8x64xbf16> to vector<8x64xbf16>
    %c0_74 = arith.constant 0 : index
    %c0_75 = arith.constant 0 : index
    %121 = vector.load %arg16[%c0_74, %c0_75] : memref<64x32xbf16, #tpu.memory_space<vmem>>, vector<64x32xbf16>
    %cst_76 = arith.constant dense<0.000000e+00> : vector<8x32xf32>
    %122 = tpu.matmul %120, %121, %cst_76 {dimension_numbers = #tpu.dot_dimension_numbers<[1], [0], [0], [1], [0, 0, 1, 1], [], []>} : vector<8x64xbf16>, vector<64x32xbf16>, vector<8x32xf32> -> vector<8x32xf32>
    %123 = arith.truncf %122 : vector<8x32xf32> to vector<8x32xbf16>
    %c0_77 = arith.constant 0 : index
    %c0_78 = arith.constant 0 : index
    %124 = vector.load %arg10[%c0_77, %c0_78] : memref<32x32xbf16, #tpu.memory_space<vmem>>, vector<32x32xbf16>
    %cst_79 = arith.constant dense<0.000000e+00> : vector<8x32xf32>
    %125 = tpu.matmul %123, %124, %cst_79 {dimension_numbers = #tpu.dot_dimension_numbers<[1], [0], [0], [1], [0, 0, 1, 1], [], []>} : vector<8x32xbf16>, vector<32x32xbf16>, vector<8x32xf32> -> vector<8x32xf32>
    %c0_80 = arith.constant 0 : index
    %c0_81 = arith.constant 0 : index
    %126 = vector.load %arg11[%c0_80, %c0_81] : memref<32x32xbf16, #tpu.memory_space<vmem>>, vector<32x32xbf16>
    %cst_82 = arith.constant dense<0.000000e+00> : vector<8x32xf32>
    %127 = tpu.matmul %123, %126, %cst_82 {dimension_numbers = #tpu.dot_dimension_numbers<[1], [0], [0], [1], [0, 0, 1, 1], [], []>} : vector<8x32xbf16>, vector<32x32xbf16>, vector<8x32xf32> -> vector<8x32xf32>
    %128 = arith.index_cast %117 : i32 to index
    %c0_83 = arith.constant 0 : index
    %129 = vector.load %arg17[%128, %c0_83] : memref<64x32xf32, #tpu.memory_space<vmem>>, vector<8x32xf32>
    %130 = arith.addf %129, %125 : vector<8x32xf32>
    %131 = arith.negf %130 : vector<8x32xf32>
    %132 = math.exp %131 : vector<8x32xf32>
    %cst_84 = arith.constant 1.000000e+00 : f32
    %133 = vector.broadcast %cst_84 : f32 to vector<8x32xf32>
    %134 = arith.addf %133, %132 : vector<8x32xf32>
    %135 = arith.divf %133, %134 : vector<8x32xf32>
    %136 = arith.index_cast %117 : i32 to index
    %c0_85 = arith.constant 0 : index
    %137 = vector.load %arg18[%136, %c0_85] : memref<64x32xf32, #tpu.memory_space<vmem>>, vector<8x32xf32>
    %138 = arith.addf %137, %127 : vector<8x32xf32>
    %139 = arith.negf %138 : vector<8x32xf32>
    %140 = math.exp %139 : vector<8x32xf32>
    %cst_86 = arith.constant 1.000000e+00 : f32
    %141 = vector.broadcast %cst_86 : f32 to vector<8x32xf32>
    %142 = arith.addf %141, %140 : vector<8x32xf32>
    %143 = arith.divf %141, %142 : vector<8x32xf32>
    %144 = arith.index_cast %117 : i32 to index
    %c0_87 = arith.constant 0 : index
    %145 = vector.load %arg19[%144, %c0_87] : memref<64x32xf32, #tpu.memory_space<vmem>>, vector<8x32xf32>
    %146 = arith.mulf %135, %122 : vector<8x32xf32>
    %147 = arith.truncf %146 : vector<8x32xf32> to vector<8x32xbf16>
    %c0_88 = arith.constant 0 : index
    %c0_89 = arith.constant 0 : index
    %148 = vector.load %arg12[%c0_88, %c0_89] : memref<32x32xbf16, #tpu.memory_space<vmem>>, vector<32x32xbf16>
    %cst_90 = arith.constant dense<0.000000e+00> : vector<8x32xf32>
    %149 = tpu.matmul %147, %148, %cst_90 {dimension_numbers = #tpu.dot_dimension_numbers<[1], [0], [0], [1], [0, 0, 1, 1], [], []>} : vector<8x32xbf16>, vector<32x32xbf16>, vector<8x32xf32> -> vector<8x32xf32>
    %150 = arith.addf %145, %149 : vector<8x32xf32>
    %151 = math.tanh %150 : vector<8x32xf32>
    %152 = arith.mulf %143, %122 : vector<8x32xf32>
    %cst_91 = arith.constant 1.000000e+00 : f32
    %153 = vector.broadcast %cst_91 : f32 to vector<8x32xf32>
    %154 = arith.subf %153, %143 : vector<8x32xf32>
    %155 = arith.mulf %154, %151 : vector<8x32xf32>
    %156 = arith.addf %152, %155 : vector<8x32xf32>
    %157 = arith.truncf %156 : vector<8x32xf32> to vector<8x32xbf16>
    %158 = arith.index_cast %117 : i32 to index
    %c0_92 = arith.constant 0 : index
    %159 = vector.load %arg16[%158, %c0_92] : memref<64x32xbf16, #tpu.memory_space<vmem>>, vector<8x32xbf16>
    tpu.vector_store %arg16[%158, %c0_92], %157 {strides = array<i32>} : memref<64x32xbf16, #tpu.memory_space<vmem>>, vector<8x32xbf16>,
    %160 = arith.maximumf %115, %156 : vector<8x32xf32>
    %c3_i32 = arith.constant 3 : i32
    %c8_i32_93 = arith.constant 8 : i32
    %161 = arith.muli %c3_i32, %c8_i32_93 : i32
    %162 = tpu.assume_multiple %161, 8 : i32
    %c0_94 = arith.constant 0 : index
    %163 = arith.index_cast %162 : i32 to index
    %c0_95 = arith.constant 0 : index
    %164 = vector.load %arg2[%c0_94, %163, %c0_95] : memref<1x64x64xbf16, #tpu.memory_space<vmem>>, vector<1x8x64xbf16>
    %165 = vector.shape_cast %164 : vector<1x8x64xbf16> to vector<8x64xbf16>
    %c0_96 = arith.constant 0 : index
    %c0_97 = arith.constant 0 : index
    %166 = vector.load %arg16[%c0_96, %c0_97] : memref<64x32xbf16, #tpu.memory_space<vmem>>, vector<64x32xbf16>
    %cst_98 = arith.constant dense<0.000000e+00> : vector<8x32xf32>
    %167 = tpu.matmul %165, %166, %cst_98 {dimension_numbers = #tpu.dot_dimension_numbers<[1], [0], [0], [1], [0, 0, 1, 1], [], []>} : vector<8x64xbf16>, vector<64x32xbf16>, vector<8x32xf32> -> vector<8x32xf32>
    %168 = arith.truncf %167 : vector<8x32xf32> to vector<8x32xbf16>
    %c0_99 = arith.constant 0 : index
    %c0_100 = arith.constant 0 : index
    %169 = vector.load %arg10[%c0_99, %c0_100] : memref<32x32xbf16, #tpu.memory_space<vmem>>, vector<32x32xbf16>
    %cst_101 = arith.constant dense<0.000000e+00> : vector<8x32xf32>
    %170 = tpu.matmul %168, %169, %cst_101 {dimension_numbers = #tpu.dot_dimension_numbers<[1], [0], [0], [1], [0, 0, 1, 1], [], []>} : vector<8x32xbf16>, vector<32x32xbf16>, vector<8x32xf32> -> vector<8x32xf32>
    %c0_102 = arith.constant 0 : index
    %c0_103 = arith.constant 0 : index
    %171 = vector.load %arg11[%c0_102, %c0_103] : memref<32x32xbf16, #tpu.memory_space<vmem>>, vector<32x32xbf16>
    %cst_104 = arith.constant dense<0.000000e+00> : vector<8x32xf32>
    %172 = tpu.matmul %168, %171, %cst_104 {dimension_numbers = #tpu.dot_dimension_numbers<[1], [0], [0], [1], [0, 0, 1, 1], [], []>} : vector<8x32xbf16>, vector<32x32xbf16>, vector<8x32xf32> -> vector<8x32xf32>
    %173 = arith.index_cast %162 : i32 to index
    %c0_105 = arith.constant 0 : index
    %174 = vector.load %arg17[%173, %c0_105] : memref<64x32xf32, #tpu.memory_space<vmem>>, vector<8x32xf32>
    %175 = arith.addf %174, %170 : vector<8x32xf32>
    %176 = arith.negf %175 : vector<8x32xf32>
    %177 = math.exp %176 : vector<8x32xf32>
    %cst_106 = arith.constant 1.000000e+00 : f32
    %178 = vector.broadcast %cst_106 : f32 to vector<8x32xf32>
    %179 = arith.addf %178, %177 : vector<8x32xf32>
    %180 = arith.divf %178, %179 : vector<8x32xf32>
    %181 = arith.index_cast %162 : i32 to index
    %c0_107 = arith.constant 0 : index
    %182 = vector.load %arg18[%181, %c0_107] : memref<64x32xf32, #tpu.memory_space<vmem>>, vector<8x32xf32>
    %183 = arith.addf %182, %172 : vector<8x32xf32>
    %184 = arith.negf %183 : vector<8x32xf32>
    %185 = math.exp %184 : vector<8x32xf32>
    %cst_108 = arith.constant 1.000000e+00 : f32
    %186 = vector.broadcast %cst_108 : f32 to vector<8x32xf32>
    %187 = arith.addf %186, %185 : vector<8x32xf32>
    %188 = arith.divf %186, %187 : vector<8x32xf32>
    %189 = arith.index_cast %162 : i32 to index
    %c0_109 = arith.constant 0 : index
    %190 = vector.load %arg19[%189, %c0_109] : memref<64x32xf32, #tpu.memory_space<vmem>>, vector<8x32xf32>
    %191 = arith.mulf %180, %167 : vector<8x32xf32>
    %192 = arith.truncf %191 : vector<8x32xf32> to vector<8x32xbf16>
    %c0_110 = arith.constant 0 : index
    %c0_111 = arith.constant 0 : index
    %193 = vector.load %arg12[%c0_110, %c0_111] : memref<32x32xbf16, #tpu.memory_space<vmem>>, vector<32x32xbf16>
    %cst_112 = arith.constant dense<0.000000e+00> : vector<8x32xf32>
    %194 = tpu.matmul %192, %193, %cst_112 {dimension_numbers = #tpu.dot_dimension_numbers<[1], [0], [0], [1], [0, 0, 1, 1], [], []>} : vector<8x32xbf16>, vector<32x32xbf16>, vector<8x32xf32> -> vector<8x32xf32>
    %195 = arith.addf %190, %194 : vector<8x32xf32>
    %196 = math.tanh %195 : vector<8x32xf32>
    %197 = arith.mulf %188, %167 : vector<8x32xf32>
    %cst_113 = arith.constant 1.000000e+00 : f32
    %198 = vector.broadcast %cst_113 : f32 to vector<8x32xf32>
    %199 = arith.subf %198, %188 : vector<8x32xf32>
    %200 = arith.mulf %199, %196 : vector<8x32xf32>
    %201 = arith.addf %197, %200 : vector<8x32xf32>
    %202 = arith.truncf %201 : vector<8x32xf32> to vector<8x32xbf16>
    %203 = arith.index_cast %162 : i32 to index
    %c0_114 = arith.constant 0 : index
    %204 = vector.load %arg16[%203, %c0_114] : memref<64x32xbf16, #tpu.memory_space<vmem>>, vector<8x32xbf16>
    tpu.vector_store %arg16[%203, %c0_114], %202 {strides = array<i32>} : memref<64x32xbf16, #tpu.memory_space<vmem>>, vector<8x32xbf16>,
    %205 = arith.maximumf %160, %201 : vector<8x32xf32>
    %c4_i32 = arith.constant 4 : i32
    %c8_i32_115 = arith.constant 8 : i32
    %206 = arith.muli %c4_i32, %c8_i32_115 : i32
    %207 = tpu.assume_multiple %206, 8 : i32
    %c0_116 = arith.constant 0 : index
    %208 = arith.index_cast %207 : i32 to index
    %c0_117 = arith.constant 0 : index
    %209 = vector.load %arg2[%c0_116, %208, %c0_117] : memref<1x64x64xbf16, #tpu.memory_space<vmem>>, vector<1x8x64xbf16>
    %210 = vector.shape_cast %209 : vector<1x8x64xbf16> to vector<8x64xbf16>
    %c0_118 = arith.constant 0 : index
    %c0_119 = arith.constant 0 : index
    %211 = vector.load %arg16[%c0_118, %c0_119] : memref<64x32xbf16, #tpu.memory_space<vmem>>, vector<64x32xbf16>
    %cst_120 = arith.constant dense<0.000000e+00> : vector<8x32xf32>
    %212 = tpu.matmul %210, %211, %cst_120 {dimension_numbers = #tpu.dot_dimension_numbers<[1], [0], [0], [1], [0, 0, 1, 1], [], []>} : vector<8x64xbf16>, vector<64x32xbf16>, vector<8x32xf32> -> vector<8x32xf32>
    %213 = arith.truncf %212 : vector<8x32xf32> to vector<8x32xbf16>
    %c0_121 = arith.constant 0 : index
    %c0_122 = arith.constant 0 : index
    %214 = vector.load %arg10[%c0_121, %c0_122] : memref<32x32xbf16, #tpu.memory_space<vmem>>, vector<32x32xbf16>
    %cst_123 = arith.constant dense<0.000000e+00> : vector<8x32xf32>
    %215 = tpu.matmul %213, %214, %cst_123 {dimension_numbers = #tpu.dot_dimension_numbers<[1], [0], [0], [1], [0, 0, 1, 1], [], []>} : vector<8x32xbf16>, vector<32x32xbf16>, vector<8x32xf32> -> vector<8x32xf32>
    %c0_124 = arith.constant 0 : index
    %c0_125 = arith.constant 0 : index
    %216 = vector.load %arg11[%c0_124, %c0_125] : memref<32x32xbf16, #tpu.memory_space<vmem>>, vector<32x32xbf16>
    %cst_126 = arith.constant dense<0.000000e+00> : vector<8x32xf32>
    %217 = tpu.matmul %213, %216, %cst_126 {dimension_numbers = #tpu.dot_dimension_numbers<[1], [0], [0], [1], [0, 0, 1, 1], [], []>} : vector<8x32xbf16>, vector<32x32xbf16>, vector<8x32xf32> -> vector<8x32xf32>
    %218 = arith.index_cast %207 : i32 to index
    %c0_127 = arith.constant 0 : index
    %219 = vector.load %arg17[%218, %c0_127] : memref<64x32xf32, #tpu.memory_space<vmem>>, vector<8x32xf32>
    %220 = arith.addf %219, %215 : vector<8x32xf32>
    %221 = arith.negf %220 : vector<8x32xf32>
    %222 = math.exp %221 : vector<8x32xf32>
    %cst_128 = arith.constant 1.000000e+00 : f32
    %223 = vector.broadcast %cst_128 : f32 to vector<8x32xf32>
    %224 = arith.addf %223, %222 : vector<8x32xf32>
    %225 = arith.divf %223, %224 : vector<8x32xf32>
    %226 = arith.index_cast %207 : i32 to index
    %c0_129 = arith.constant 0 : index
    %227 = vector.load %arg18[%226, %c0_129] : memref<64x32xf32, #tpu.memory_space<vmem>>, vector<8x32xf32>
    %228 = arith.addf %227, %217 : vector<8x32xf32>
    %229 = arith.negf %228 : vector<8x32xf32>
    %230 = math.exp %229 : vector<8x32xf32>
    %cst_130 = arith.constant 1.000000e+00 : f32
    %231 = vector.broadcast %cst_130 : f32 to vector<8x32xf32>
    %232 = arith.addf %231, %230 : vector<8x32xf32>
    %233 = arith.divf %231, %232 : vector<8x32xf32>
    %234 = arith.index_cast %207 : i32 to index
    %c0_131 = arith.constant 0 : index
    %235 = vector.load %arg19[%234, %c0_131] : memref<64x32xf32, #tpu.memory_space<vmem>>, vector<8x32xf32>
    %236 = arith.mulf %225, %212 : vector<8x32xf32>
    %237 = arith.truncf %236 : vector<8x32xf32> to vector<8x32xbf16>
    %c0_132 = arith.constant 0 : index
    %c0_133 = arith.constant 0 : index
    %238 = vector.load %arg12[%c0_132, %c0_133] : memref<32x32xbf16, #tpu.memory_space<vmem>>, vector<32x32xbf16>
    %cst_134 = arith.constant dense<0.000000e+00> : vector<8x32xf32>
    %239 = tpu.matmul %237, %238, %cst_134 {dimension_numbers = #tpu.dot_dimension_numbers<[1], [0], [0], [1], [0, 0, 1, 1], [], []>} : vector<8x32xbf16>, vector<32x32xbf16>, vector<8x32xf32> -> vector<8x32xf32>
    %240 = arith.addf %235, %239 : vector<8x32xf32>
    %241 = math.tanh %240 : vector<8x32xf32>
    %242 = arith.mulf %233, %212 : vector<8x32xf32>
    %cst_135 = arith.constant 1.000000e+00 : f32
    %243 = vector.broadcast %cst_135 : f32 to vector<8x32xf32>
    %244 = arith.subf %243, %233 : vector<8x32xf32>
    %245 = arith.mulf %244, %241 : vector<8x32xf32>
    %246 = arith.addf %242, %245 : vector<8x32xf32>
    %247 = arith.truncf %246 : vector<8x32xf32> to vector<8x32xbf16>
    %248 = arith.index_cast %207 : i32 to index
    %c0_136 = arith.constant 0 : index
    %249 = vector.load %arg16[%248, %c0_136] : memref<64x32xbf16, #tpu.memory_space<vmem>>, vector<8x32xbf16>
    tpu.vector_store %arg16[%248, %c0_136], %247 {strides = array<i32>} : memref<64x32xbf16, #tpu.memory_space<vmem>>, vector<8x32xbf16>,
    %250 = arith.maximumf %205, %246 : vector<8x32xf32>
    %c5_i32 = arith.constant 5 : i32
    %c8_i32_137 = arith.constant 8 : i32
    %251 = arith.muli %c5_i32, %c8_i32_137 : i32
    %252 = tpu.assume_multiple %251, 8 : i32
    %c0_138 = arith.constant 0 : index
    %253 = arith.index_cast %252 : i32 to index
    %c0_139 = arith.constant 0 : index
    %254 = vector.load %arg2[%c0_138, %253, %c0_139] : memref<1x64x64xbf16, #tpu.memory_space<vmem>>, vector<1x8x64xbf16>
    %255 = vector.shape_cast %254 : vector<1x8x64xbf16> to vector<8x64xbf16>
    %c0_140 = arith.constant 0 : index
    %c0_141 = arith.constant 0 : index
    %256 = vector.load %arg16[%c0_140, %c0_141] : memref<64x32xbf16, #tpu.memory_space<vmem>>, vector<64x32xbf16>
    %cst_142 = arith.constant dense<0.000000e+00> : vector<8x32xf32>
    %257 = tpu.matmul %255, %256, %cst_142 {dimension_numbers = #tpu.dot_dimension_numbers<[1], [0], [0], [1], [0, 0, 1, 1], [], []>} : vector<8x64xbf16>, vector<64x32xbf16>, vector<8x32xf32> -> vector<8x32xf32>
    %258 = arith.truncf %257 : vector<8x32xf32> to vector<8x32xbf16>
    %c0_143 = arith.constant 0 : index
    %c0_144 = arith.constant 0 : index
    %259 = vector.load %arg10[%c0_143, %c0_144] : memref<32x32xbf16, #tpu.memory_space<vmem>>, vector<32x32xbf16>
    %cst_145 = arith.constant dense<0.000000e+00> : vector<8x32xf32>
    %260 = tpu.matmul %258, %259, %cst_145 {dimension_numbers = #tpu.dot_dimension_numbers<[1], [0], [0], [1], [0, 0, 1, 1], [], []>} : vector<8x32xbf16>, vector<32x32xbf16>, vector<8x32xf32> -> vector<8x32xf32>
    %c0_146 = arith.constant 0 : index
    %c0_147 = arith.constant 0 : index
    %261 = vector.load %arg11[%c0_146, %c0_147] : memref<32x32xbf16, #tpu.memory_space<vmem>>, vector<32x32xbf16>
    %cst_148 = arith.constant dense<0.000000e+00> : vector<8x32xf32>
    %262 = tpu.matmul %258, %261, %cst_148 {dimension_numbers = #tpu.dot_dimension_numbers<[1], [0], [0], [1], [0, 0, 1, 1], [], []>} : vector<8x32xbf16>, vector<32x32xbf16>, vector<8x32xf32> -> vector<8x32xf32>
    %263 = arith.index_cast %252 : i32 to index
    %c0_149 = arith.constant 0 : index
    %264 = vector.load %arg17[%263, %c0_149] : memref<64x32xf32, #tpu.memory_space<vmem>>, vector<8x32xf32>
    %265 = arith.addf %264, %260 : vector<8x32xf32>
    %266 = arith.negf %265 : vector<8x32xf32>
    %267 = math.exp %266 : vector<8x32xf32>
    %cst_150 = arith.constant 1.000000e+00 : f32
    %268 = vector.broadcast %cst_150 : f32 to vector<8x32xf32>
    %269 = arith.addf %268, %267 : vector<8x32xf32>
    %270 = arith.divf %268, %269 : vector<8x32xf32>
    %271 = arith.index_cast %252 : i32 to index
    %c0_151 = arith.constant 0 : index
    %272 = vector.load %arg18[%271, %c0_151] : memref<64x32xf32, #tpu.memory_space<vmem>>, vector<8x32xf32>
    %273 = arith.addf %272, %262 : vector<8x32xf32>
    %274 = arith.negf %273 : vector<8x32xf32>
    %275 = math.exp %274 : vector<8x32xf32>
    %cst_152 = arith.constant 1.000000e+00 : f32
    %276 = vector.broadcast %cst_152 : f32 to vector<8x32xf32>
    %277 = arith.addf %276, %275 : vector<8x32xf32>
    %278 = arith.divf %276, %277 : vector<8x32xf32>
    %279 = arith.index_cast %252 : i32 to index
    %c0_153 = arith.constant 0 : index
    %280 = vector.load %arg19[%279, %c0_153] : memref<64x32xf32, #tpu.memory_space<vmem>>, vector<8x32xf32>
    %281 = arith.mulf %270, %257 : vector<8x32xf32>
    %282 = arith.truncf %281 : vector<8x32xf32> to vector<8x32xbf16>
    %c0_154 = arith.constant 0 : index
    %c0_155 = arith.constant 0 : index
    %283 = vector.load %arg12[%c0_154, %c0_155] : memref<32x32xbf16, #tpu.memory_space<vmem>>, vector<32x32xbf16>
    %cst_156 = arith.constant dense<0.000000e+00> : vector<8x32xf32>
    %284 = tpu.matmul %282, %283, %cst_156 {dimension_numbers = #tpu.dot_dimension_numbers<[1], [0], [0], [1], [0, 0, 1, 1], [], []>} : vector<8x32xbf16>, vector<32x32xbf16>, vector<8x32xf32> -> vector<8x32xf32>
    %285 = arith.addf %280, %284 : vector<8x32xf32>
    %286 = math.tanh %285 : vector<8x32xf32>
    %287 = arith.mulf %278, %257 : vector<8x32xf32>
    %cst_157 = arith.constant 1.000000e+00 : f32
    %288 = vector.broadcast %cst_157 : f32 to vector<8x32xf32>
    %289 = arith.subf %288, %278 : vector<8x32xf32>
    %290 = arith.mulf %289, %286 : vector<8x32xf32>
    %291 = arith.addf %287, %290 : vector<8x32xf32>
    %292 = arith.truncf %291 : vector<8x32xf32> to vector<8x32xbf16>
    %293 = arith.index_cast %252 : i32 to index
    %c0_158 = arith.constant 0 : index
    %294 = vector.load %arg16[%293, %c0_158] : memref<64x32xbf16, #tpu.memory_space<vmem>>, vector<8x32xbf16>
    tpu.vector_store %arg16[%293, %c0_158], %292 {strides = array<i32>} : memref<64x32xbf16, #tpu.memory_space<vmem>>, vector<8x32xbf16>,
    %295 = arith.maximumf %250, %291 : vector<8x32xf32>
    %c6_i32 = arith.constant 6 : i32
    %c8_i32_159 = arith.constant 8 : i32
    %296 = arith.muli %c6_i32, %c8_i32_159 : i32
    %297 = tpu.assume_multiple %296, 8 : i32
    %c0_160 = arith.constant 0 : index
    %298 = arith.index_cast %297 : i32 to index
    %c0_161 = arith.constant 0 : index
    %299 = vector.load %arg2[%c0_160, %298, %c0_161] : memref<1x64x64xbf16, #tpu.memory_space<vmem>>, vector<1x8x64xbf16>
    %300 = vector.shape_cast %299 : vector<1x8x64xbf16> to vector<8x64xbf16>
    %c0_162 = arith.constant 0 : index
    %c0_163 = arith.constant 0 : index
    %301 = vector.load %arg16[%c0_162, %c0_163] : memref<64x32xbf16, #tpu.memory_space<vmem>>, vector<64x32xbf16>
    %cst_164 = arith.constant dense<0.000000e+00> : vector<8x32xf32>
    %302 = tpu.matmul %300, %301, %cst_164 {dimension_numbers = #tpu.dot_dimension_numbers<[1], [0], [0], [1], [0, 0, 1, 1], [], []>} : vector<8x64xbf16>, vector<64x32xbf16>, vector<8x32xf32> -> vector<8x32xf32>
    %303 = arith.truncf %302 : vector<8x32xf32> to vector<8x32xbf16>
    %c0_165 = arith.constant 0 : index
    %c0_166 = arith.constant 0 : index
    %304 = vector.load %arg10[%c0_165, %c0_166] : memref<32x32xbf16, #tpu.memory_space<vmem>>, vector<32x32xbf16>
    %cst_167 = arith.constant dense<0.000000e+00> : vector<8x32xf32>
    %305 = tpu.matmul %303, %304, %cst_167 {dimension_numbers = #tpu.dot_dimension_numbers<[1], [0], [0], [1], [0, 0, 1, 1], [], []>} : vector<8x32xbf16>, vector<32x32xbf16>, vector<8x32xf32> -> vector<8x32xf32>
    %c0_168 = arith.constant 0 : index
    %c0_169 = arith.constant 0 : index
    %306 = vector.load %arg11[%c0_168, %c0_169] : memref<32x32xbf16, #tpu.memory_space<vmem>>, vector<32x32xbf16>
    %cst_170 = arith.constant dense<0.000000e+00> : vector<8x32xf32>
    %307 = tpu.matmul %303, %306, %cst_170 {dimension_numbers = #tpu.dot_dimension_numbers<[1], [0], [0], [1], [0, 0, 1, 1], [], []>} : vector<8x32xbf16>, vector<32x32xbf16>, vector<8x32xf32> -> vector<8x32xf32>
    %308 = arith.index_cast %297 : i32 to index
    %c0_171 = arith.constant 0 : index
    %309 = vector.load %arg17[%308, %c0_171] : memref<64x32xf32, #tpu.memory_space<vmem>>, vector<8x32xf32>
    %310 = arith.addf %309, %305 : vector<8x32xf32>
    %311 = arith.negf %310 : vector<8x32xf32>
    %312 = math.exp %311 : vector<8x32xf32>
    %cst_172 = arith.constant 1.000000e+00 : f32
    %313 = vector.broadcast %cst_172 : f32 to vector<8x32xf32>
    %314 = arith.addf %313, %312 : vector<8x32xf32>
    %315 = arith.divf %313, %314 : vector<8x32xf32>
    %316 = arith.index_cast %297 : i32 to index
    %c0_173 = arith.constant 0 : index
    %317 = vector.load %arg18[%316, %c0_173] : memref<64x32xf32, #tpu.memory_space<vmem>>, vector<8x32xf32>
    %318 = arith.addf %317, %307 : vector<8x32xf32>
    %319 = arith.negf %318 : vector<8x32xf32>
    %320 = math.exp %319 : vector<8x32xf32>
    %cst_174 = arith.constant 1.000000e+00 : f32
    %321 = vector.broadcast %cst_174 : f32 to vector<8x32xf32>
    %322 = arith.addf %321, %320 : vector<8x32xf32>
    %323 = arith.divf %321, %322 : vector<8x32xf32>
    %324 = arith.index_cast %297 : i32 to index
    %c0_175 = arith.constant 0 : index
    %325 = vector.load %arg19[%324, %c0_175] : memref<64x32xf32, #tpu.memory_space<vmem>>, vector<8x32xf32>
    %326 = arith.mulf %315, %302 : vector<8x32xf32>
    %327 = arith.truncf %326 : vector<8x32xf32> to vector<8x32xbf16>
    %c0_176 = arith.constant 0 : index
    %c0_177 = arith.constant 0 : index
    %328 = vector.load %arg12[%c0_176, %c0_177] : memref<32x32xbf16, #tpu.memory_space<vmem>>, vector<32x32xbf16>
    %cst_178 = arith.constant dense<0.000000e+00> : vector<8x32xf32>
    %329 = tpu.matmul %327, %328, %cst_178 {dimension_numbers = #tpu.dot_dimension_numbers<[1], [0], [0], [1], [0, 0, 1, 1], [], []>} : vector<8x32xbf16>, vector<32x32xbf16>, vector<8x32xf32> -> vector<8x32xf32>
    %330 = arith.addf %325, %329 : vector<8x32xf32>
    %331 = math.tanh %330 : vector<8x32xf32>
    %332 = arith.mulf %323, %302 : vector<8x32xf32>
    %cst_179 = arith.constant 1.000000e+00 : f32
    %333 = vector.broadcast %cst_179 : f32 to vector<8x32xf32>
    %334 = arith.subf %333, %323 : vector<8x32xf32>
    %335 = arith.mulf %334, %331 : vector<8x32xf32>
    %336 = arith.addf %332, %335 : vector<8x32xf32>
    %337 = arith.truncf %336 : vector<8x32xf32> to vector<8x32xbf16>
    %338 = arith.index_cast %297 : i32 to index
    %c0_180 = arith.constant 0 : index
    %339 = vector.load %arg16[%338, %c0_180] : memref<64x32xbf16, #tpu.memory_space<vmem>>, vector<8x32xbf16>
    tpu.vector_store %arg16[%338, %c0_180], %337 {strides = array<i32>} : memref<64x32xbf16, #tpu.memory_space<vmem>>, vector<8x32xbf16>,
    %340 = arith.maximumf %295, %336 : vector<8x32xf32>
    %c7_i32 = arith.constant 7 : i32
    %c8_i32_181 = arith.constant 8 : i32
    %341 = arith.muli %c7_i32, %c8_i32_181 : i32
    %342 = tpu.assume_multiple %341, 8 : i32
    %c0_182 = arith.constant 0 : index
    %343 = arith.index_cast %342 : i32 to index
    %c0_183 = arith.constant 0 : index
    %344 = vector.load %arg2[%c0_182, %343, %c0_183] : memref<1x64x64xbf16, #tpu.memory_space<vmem>>, vector<1x8x64xbf16>
    %345 = vector.shape_cast %344 : vector<1x8x64xbf16> to vector<8x64xbf16>
    %c0_184 = arith.constant 0 : index
    %c0_185 = arith.constant 0 : index
    %346 = vector.load %arg16[%c0_184, %c0_185] : memref<64x32xbf16, #tpu.memory_space<vmem>>, vector<64x32xbf16>
    %cst_186 = arith.constant dense<0.000000e+00> : vector<8x32xf32>
    %347 = tpu.matmul %345, %346, %cst_186 {dimension_numbers = #tpu.dot_dimension_numbers<[1], [0], [0], [1], [0, 0, 1, 1], [], []>} : vector<8x64xbf16>, vector<64x32xbf16>, vector<8x32xf32> -> vector<8x32xf32>
    %348 = arith.truncf %347 : vector<8x32xf32> to vector<8x32xbf16>
    %c0_187 = arith.constant 0 : index
    %c0_188 = arith.constant 0 : index
    %349 = vector.load %arg10[%c0_187, %c0_188] : memref<32x32xbf16, #tpu.memory_space<vmem>>, vector<32x32xbf16>
    %cst_189 = arith.constant dense<0.000000e+00> : vector<8x32xf32>
    %350 = tpu.matmul %348, %349, %cst_189 {dimension_numbers = #tpu.dot_dimension_numbers<[1], [0], [0], [1], [0, 0, 1, 1], [], []>} : vector<8x32xbf16>, vector<32x32xbf16>, vector<8x32xf32> -> vector<8x32xf32>
    %c0_190 = arith.constant 0 : index
    %c0_191 = arith.constant 0 : index
    %351 = vector.load %arg11[%c0_190, %c0_191] : memref<32x32xbf16, #tpu.memory_space<vmem>>, vector<32x32xbf16>
    %cst_192 = arith.constant dense<0.000000e+00> : vector<8x32xf32>
    %352 = tpu.matmul %348, %351, %cst_192 {dimension_numbers = #tpu.dot_dimension_numbers<[1], [0], [0], [1], [0, 0, 1, 1], [], []>} : vector<8x32xbf16>, vector<32x32xbf16>, vector<8x32xf32> -> vector<8x32xf32>
    %353 = arith.index_cast %342 : i32 to index
    %c0_193 = arith.constant 0 : index
    %354 = vector.load %arg17[%353, %c0_193] : memref<64x32xf32, #tpu.memory_space<vmem>>, vector<8x32xf32>
    %355 = arith.addf %354, %350 : vector<8x32xf32>
    %356 = arith.negf %355 : vector<8x32xf32>
    %357 = math.exp %356 : vector<8x32xf32>
    %cst_194 = arith.constant 1.000000e+00 : f32
    %358 = vector.broadcast %cst_194 : f32 to vector<8x32xf32>
    %359 = arith.addf %358, %357 : vector<8x32xf32>
    %360 = arith.divf %358, %359 : vector<8x32xf32>
    %361 = arith.index_cast %342 : i32 to index
    %c0_195 = arith.constant 0 : index
    %362 = vector.load %arg18[%361, %c0_195] : memref<64x32xf32, #tpu.memory_space<vmem>>, vector<8x32xf32>
    %363 = arith.addf %362, %352 : vector<8x32xf32>
    %364 = arith.negf %363 : vector<8x32xf32>
    %365 = math.exp %364 : vector<8x32xf32>
    %cst_196 = arith.constant 1.000000e+00 : f32
    %366 = vector.broadcast %cst_196 : f32 to vector<8x32xf32>
    %367 = arith.addf %366, %365 : vector<8x32xf32>
    %368 = arith.divf %366, %367 : vector<8x32xf32>
    %369 = arith.index_cast %342 : i32 to index
    %c0_197 = arith.constant 0 : index
    %370 = vector.load %arg19[%369, %c0_197] : memref<64x32xf32, #tpu.memory_space<vmem>>, vector<8x32xf32>
    %371 = arith.mulf %360, %347 : vector<8x32xf32>
    %372 = arith.truncf %371 : vector<8x32xf32> to vector<8x32xbf16>
    %c0_198 = arith.constant 0 : index
    %c0_199 = arith.constant 0 : index
    %373 = vector.load %arg12[%c0_198, %c0_199] : memref<32x32xbf16, #tpu.memory_space<vmem>>, vector<32x32xbf16>
    %cst_200 = arith.constant dense<0.000000e+00> : vector<8x32xf32>
    %374 = tpu.matmul %372, %373, %cst_200 {dimension_numbers = #tpu.dot_dimension_numbers<[1], [0], [0], [1], [0, 0, 1, 1], [], []>} : vector<8x32xbf16>, vector<32x32xbf16>, vector<8x32xf32> -> vector<8x32xf32>
    %375 = arith.addf %370, %374 : vector<8x32xf32>
    %376 = math.tanh %375 : vector<8x32xf32>
    %377 = arith.mulf %368, %347 : vector<8x32xf32>
    %cst_201 = arith.constant 1.000000e+00 : f32
    %378 = vector.broadcast %cst_201 : f32 to vector<8x32xf32>
    %379 = arith.subf %378, %368 : vector<8x32xf32>
    %380 = arith.mulf %379, %376 : vector<8x32xf32>
    %381 = arith.addf %377, %380 : vector<8x32xf32>
    %382 = arith.truncf %381 : vector<8x32xf32> to vector<8x32xbf16>
    %383 = arith.index_cast %342 : i32 to index
    %c0_202 = arith.constant 0 : index
    %384 = vector.load %arg16[%383, %c0_202] : memref<64x32xbf16, #tpu.memory_space<vmem>>, vector<8x32xbf16>
    tpu.vector_store %arg16[%383, %c0_202], %382 {strides = array<i32>} : memref<64x32xbf16, #tpu.memory_space<vmem>>, vector<8x32xbf16>,
    %385 = arith.maximumf %340, %381 : vector<8x32xf32>
    %c8_i32_203 = arith.constant 8 : i32
    %c0_204 = arith.constant 0 : index
    %c0_205 = arith.constant 0 : index
    %386 = vector.load %arg13[%c0_204, %c0_205] : memref<32x128xf32, #tpu.memory_space<vmem>>, vector<32x128xf32>
    %cst_206 = arith.constant dense<0.000000e+00> : vector<8x128xf32>
    %387 = tpu.matmul %385, %386, %cst_206 {dimension_numbers = #tpu.dot_dimension_numbers<[1], [0], [0], [1], [0, 0, 1, 1], [], []>} : vector<8x32xf32>, vector<32x128xf32>, vector<8x128xf32> -> vector<8x128xf32>
    %c0_207 = arith.constant 0 : index
    %c0_208 = arith.constant 0 : index
    %388 = vector.load %arg14[%c0_207, %c0_208] : memref<1x128xf32, #tpu.memory_space<vmem>>, vector<1x128xf32>
    %389 = vector.broadcast %388 : vector<1x128xf32> to vector<8x128xf32>
    %390 = arith.addf %387, %389 : vector<8x128xf32>
    %c0_209 = arith.constant 0 : index
    %c0_210 = arith.constant 0 : index
    %c0_211 = arith.constant 0 : index
    %391 = vector.load %arg15[%c0_209, %c0_210, %c0_211] : memref<1x8x128xf32, #tpu.memory_space<vmem>>, vector<1x8x128xf32>
    %392 = vector.shape_cast %391 : vector<1x8x128xf32> to vector<8x128xf32>
    %393 = vector.shape_cast %390 : vector<8x128xf32> to vector<1x8x128xf32>
    tpu.vector_store %arg15[%c0_209, %c0_210, %c0_211], %393 {strides = array<i32>} : memref<1x8x128xf32, #tpu.memory_space<vmem>>, vector<1x8x128xf32>,
    return
  }
  func.func @transform_0(%arg0: i32) -> (i32, i32, i32) {
    %c0_i32 = arith.constant 0 : i32
    %c0_i32_0 = arith.constant 0 : i32
    %c0_i32_1 = arith.constant 0 : i32
    return %arg0, %c0_i32, %c0_i32_0 : i32, i32, i32
  }
  func.func @transform_1(%arg0: i32) -> (i32, i32, i32) {
    %c0_i32 = arith.constant 0 : i32
    %c0_i32_0 = arith.constant 0 : i32
    %c0_i32_1 = arith.constant 0 : i32
    return %arg0, %c0_i32, %c0_i32_0 : i32, i32, i32
  }
  func.func @transform_2(%arg0: i32) -> (i32, i32) {
    %c0_i32 = arith.constant 0 : i32
    %c0_i32_0 = arith.constant 0 : i32
    %c0_i32_1 = arith.constant 0 : i32
    return %c0_i32, %c0_i32_0 : i32, i32
  }
  func.func @transform_3(%arg0: i32) -> (i32, i32) {
    %c0_i32 = arith.constant 0 : i32
    %c0_i32_0 = arith.constant 0 : i32
    %c0_i32_1 = arith.constant 0 : i32
    return %c0_i32, %c0_i32_0 : i32, i32
  }
  func.func @transform_4(%arg0: i32) -> (i32, i32) {
    %c0_i32 = arith.constant 0 : i32
    %c0_i32_0 = arith.constant 0 : i32
    %c0_i32_1 = arith.constant 0 : i32
    return %c0_i32, %c0_i32_0 : i32, i32
  }
  func.func @transform_5(%arg0: i32) -> (i32, i32) {
    %c0_i32 = arith.constant 0 : i32
    %c0_i32_0 = arith.constant 0 : i32
    %c0_i32_1 = arith.constant 0 : i32
    return %c0_i32, %c0_i32_0 : i32, i32
  }
  func.func @transform_6(%arg0: i32) -> (i32, i32) {
    %c0_i32 = arith.constant 0 : i32
    %c0_i32_0 = arith.constant 0 : i32
    %c0_i32_1 = arith.constant 0 : i32
    return %c0_i32, %c0_i32_0 : i32, i32
  }
  func.func @transform_7(%arg0: i32) -> (i32, i32) {
    %c0_i32 = arith.constant 0 : i32
    %c0_i32_0 = arith.constant 0 : i32
    %c0_i32_1 = arith.constant 0 : i32
    return %c0_i32, %c0_i32_0 : i32, i32
  }
  func.func @transform_8(%arg0: i32) -> (i32, i32) {
    %c0_i32 = arith.constant 0 : i32
    %c0_i32_0 = arith.constant 0 : i32
    %c0_i32_1 = arith.constant 0 : i32
    return %c0_i32, %c0_i32_0 : i32, i32
  }
  func.func @transform_9(%arg0: i32) -> (i32, i32) {
    %c0_i32 = arith.constant 0 : i32
    %c0_i32_0 = arith.constant 0 : i32
    %c0_i32_1 = arith.constant 0 : i32
    return %c0_i32, %c0_i32_0 : i32, i32
  }
  func.func @transform_10(%arg0: i32) -> (i32, i32) {
    %c0_i32 = arith.constant 0 : i32
    %c0_i32_0 = arith.constant 0 : i32
    %c0_i32_1 = arith.constant 0 : i32
    return %c0_i32, %c0_i32_0 : i32, i32
  }
  func.func @transform_11(%arg0: i32) -> (i32, i32) {
    %c0_i32 = arith.constant 0 : i32
    %c0_i32_0 = arith.constant 0 : i32
    %c0_i32_1 = arith.constant 0 : i32
    return %c0_i32, %c0_i32_0 : i32, i32
  }
  func.func @transform_12(%arg0: i32) -> (i32, i32) {
    %c0_i32 = arith.constant 0 : i32
    %c0_i32_0 = arith.constant 0 : i32
    %c0_i32_1 = arith.constant 0 : i32
    return %c0_i32, %c0_i32_0 : i32, i32
  }
  func.func @transform_13(%arg0: i32) -> (i32, i32) {
    %c0_i32 = arith.constant 0 : i32
    %c0_i32_0 = arith.constant 0 : i32
    %c0_i32_1 = arith.constant 0 : i32
    return %c0_i32, %c0_i32_0 : i32, i32
  }
  func.func @transform_14(%arg0: i32) -> (i32, i32, i32) {
    %c0_i32 = arith.constant 0 : i32
    %c0_i32_0 = arith.constant 0 : i32
    %c0_i32_1 = arith.constant 0 : i32
    return %arg0, %c0_i32, %c0_i32_0 : i32, i32, i32
  }
}

</mosaic_0001>

<bundles_post_ra>
// kernel: tpu_custom_call.1
= control target key start
LH: loop header
LB: loop body
LE: loop exit
PB: predicated region body
PF: predicated region fallthrough
CT: control target
= control target key end

     0   :  { %19 = vsyncpa [#allocation7], 0  ;;  %s3493_s0 = inlined_call_operand.vmem [shape: bf16[1,64,16], index: 0, kind: input, shape index: {}]   ;;  %s3494_s1 = inlined_call_operand.vmem [shape: bf16[1,64,64], index: 1, kind: input, shape index: {}]   ;;  %s3495_s2 = inlined_call_operand.hbm [shape: bf16[16,32], index: 2, kind: input, shape index: {}]   ;;  %s3496_s3 = inlined_call_operand.hbm [shape: bf16[32,32], index: 3, kind: input, shape index: {}]   ;;  %s3497_s4 = inlined_call_operand.hbm [shape: bf16[32,32], index: 4, kind: input, shape index: {}]   ;;  %s3498_s5 = inlined_call_operand.hbm [shape: bf16[32,32], index: 5, kind: input, shape index: {}]   ;;  %s3499_s6 = inlined_call_operand.hbm [shape: f32[1,32], index: 6, kind: input, shape index: {}]   ;;  %s3500_s7 = inlined_call_operand.hbm [shape: f32[1,32], index: 7, kind: input, shape index: {}]   ;;  %s3501_s8 = inlined_call_operand.hbm [shape: f32[1,32], index: 8, kind: input, shape index: {}]   ;;  %s3502_s9 = inlined_call_operand.vmem [shape: bf16[32,32], index: 9, kind: input, shape index: {}]   ;;  %s3503_s10 = inlined_call_operand.hbm [shape: bf16[32,32], index: 10, kind: input, shape index: {}]   ;;  %s3504_s11 = inlined_call_operand.hbm [shape: bf16[32,32], index: 11, kind: input, shape index: {}]   ;;  %s3505_s12 = inlined_call_operand.hbm [shape: f32[32,128], index: 12, kind: input, shape index: {}]   ;;  %s3506_s13 = inlined_call_operand.vmem [shape: f32[1,128], index: 13, kind: input, shape index: {}]   ;;  %s3507_s14 = inlined_call_operand.hbm [shape: f32[1,8,128], index: 14, kind: output, shape index: {}]  }
   0x1   :  { %20 = vsyncpa [#allocation10], 0 }
   0x2   :  { %21 = vsyncpa [#allocation13], 0 }
   0x3   :  { %22 = vsyncpa [#allocation16], 0 }
   0x4   :  { %23 = vsyncpa [#allocation19], 0 }
   0x5   :  { %24 = vsyncpa [#allocation22], 0 }
   0x6   :  { %25 = vsyncpa [#allocation8], 0  ;;  %s47_s15 = sshll.u32 %s3496_s3, 4  ;;  %s3067_s16 = smov [#allocation9]   ;;  %s48_s15 = int_to_ptr.hbm [resolvable:$true] %s47_s15 }
   0x7   :  { %s49_s17 = sshll.u32 %s3067_s16, 4  ;;  %s73_s20 = sshll.u32 %s3498_s5, 4  ;;  %s50_s17 = int_to_ptr.vmem [resolvable:$true] %s49_s17  ;;  %s74_s20 = int_to_ptr.hbm [resolvable:$true] %s73_s20 }
   0x8   :  { %s3068_s21 = smov 64   ;;  %s3069_s22 = smov 4  }
   0x9   :  { %55 = dma.hbm_to_vmem [thread:$0]  %s48_s15, 256, %s50_s17, [#allocation10], %s3068_s21, %s3068_s21, %s3069_s22  }
   0xa   :  { %s3070_s23 = smov [#allocation12]   ;;  %s98_s3 = sshll.u32 %s3500_s7, 4  ;;  %s99_s3 = int_to_ptr.hbm [resolvable:$true] %s98_s3 }
   0xb   :  { %s75_s24 = sshll.u32 %s3070_s23, 4  ;;  %s121_s28 = sshll.u32 %s3503_s10, 4  ;;  %s76_s24 = int_to_ptr.vmem [resolvable:$true] %s75_s24  ;;  %s122_s28 = int_to_ptr.hbm [resolvable:$true] %s121_s28 }
   0xc   :  { %81 = dma.hbm_to_vmem [thread:$0]  %s74_s20, 256, %s76_s24, [#allocation13], %s3068_s21, %s3068_s21, %s3069_s22  }
   0xd   :  { %s3071_s29 = smov [#allocation15]   ;;  %s3072_s15 = smov [#allocation18]  }
   0xe   :  { %s100_s30 = sshll.u32 %s3071_s29, 4  ;;  %s123_s16 = sshll.u32 %s3072_s15, 4  ;;  %s101_s30 = int_to_ptr.vmem [resolvable:$true] %s100_s30  ;;  %s124_s16 = int_to_ptr.vmem [resolvable:$true] %s123_s16 }
   0xf   :  { %103 = dma.hbm_to_vmem [thread:$0]  %s99_s3, 16, %s101_s30, [#allocation16]  }
  0x10   :  { %s34_s7 = sshll.u32 %s3495_s2, 4  ;;  %s60_s10 = sshll.u32 %s3497_s4, 4  ;;  %s35_s7 = int_to_ptr.hbm [resolvable:$true] %s34_s7  ;;  %s61_s10 = int_to_ptr.hbm [resolvable:$true] %s60_s10 }
  0x11   :  { %129 = dma.hbm_to_vmem [thread:$0]  %s122_s28, 256, %s124_s16, [#allocation19], %s3068_s21, %s3068_s21, %s3069_s22  }
  0x12   :  { %s3073_s23 = smov [#allocation6]   ;;  %s3074_s25 = smov [#allocation11]  }
  0x13   :  { %s36_s24 = sshll.u32 %s3073_s23, 4  ;;  %s62_s2 = sshll.u32 %s3074_s25, 4  ;;  %s37_s24 = int_to_ptr.vmem [resolvable:$true] %s36_s24  ;;  %s63_s2 = int_to_ptr.vmem [resolvable:$true] %s62_s2 }
  0x14   :  { %42 = dma.hbm_to_vmem [thread:$0]  %s35_s7, 128, %s37_s24, [#allocation7], %s3068_s21, %s3068_s21, %s3069_s22  }
  0x15   :  { %s87_s5 = sshll.u32 %s3499_s6, 4  ;;  %s109_s28 = sshll.u32 %s3501_s8, 4  ;;  %s88_s5 = int_to_ptr.hbm [resolvable:$true] %s87_s5  ;;  %s110_s28 = int_to_ptr.hbm [resolvable:$true] %s109_s28 }
  0x16   :  { %68 = dma.hbm_to_vmem [thread:$0]  %s61_s10, 256, %s63_s2, [#allocation10], %s3068_s21, %s3068_s21, %s3069_s22  }
  0x17   :  { %s3075_s29 = smov [#allocation14]   ;;  %s3076_s15 = smov [#allocation17]  }
  0x18   :  { %s89_s30 = sshll.u32 %s3075_s29, 4  ;;  %s111_s16 = sshll.u32 %s3076_s15, 4  ;;  %s90_s30 = int_to_ptr.vmem [resolvable:$true] %s89_s30  ;;  %s112_s16 = int_to_ptr.vmem [resolvable:$true] %s111_s16 }
  0x19   :  { %92 = dma.hbm_to_vmem [thread:$0]  %s88_s5, 16, %s90_s30, [#allocation13]  }
  0x1a   :  { %s134_s6 = sshll.u32 %s3504_s11, 4  ;;  %s147_s20 = sshll.u32 %s3505_s12, 4  ;;  %s135_s6 = int_to_ptr.hbm [resolvable:$true] %s134_s6  ;;  %s148_s20 = int_to_ptr.hbm [resolvable:$true] %s147_s20 }
  0x1b   :  { %114 = dma.hbm_to_vmem [thread:$0]  %s110_s28, 16, %s112_s16, [#allocation16]  }
  0x1c   :  { %s3077_s10 = smov [#allocation20]   ;;  %s3078_s23 = smov [#allocation21]  }
  0x1d   :  { %s136_s8 = sshll.u32 %s3077_s10, 4  ;;  %s149_s24 = sshll.u32 %s3078_s23, 4  ;;  %s137_s8 = int_to_ptr.vmem [resolvable:$true] %s136_s8  ;;  %s150_s24 = int_to_ptr.vmem [resolvable:$true] %s149_s24 }
  0x1e   :  { %142 = dma.hbm_to_vmem [thread:$0]  %s135_s6, 256, %s137_s8, [#allocation19], %s3068_s21, %s3068_s21, %s3069_s22  }
  0x1f   :  { %s3079_s25 = smov 128   ;;  %s3080_s11 = smov 8  }
  0x20   :  { %155 = dma.hbm_to_vmem [thread:$0]  %s148_s20, 512, %s150_s24, [#allocation22], %s3079_s25, %s3079_s25, %s3080_s11  }
  0x21   :  { %3053 = dma.done.wait [#allocation7], 128  }
  0x22   :  { %3054 = vsyncadd [#allocation7], 4294967168 }
  0x23   :  { %3055 = dma.done.wait [#allocation10], 512  }
  0x24   :  { %3056 = vsyncadd [#allocation10], 4294966784 }
  0x25   :  { %3057 = dma.done.wait [#allocation13], 272  }
  0x26   :  { %3058 = vsyncadd [#allocation13], 4294967024 }
  0x27   :  { %3059 = dma.done.wait [#allocation16], 32  }
  0x28   :  { %3060 = vsyncadd [#allocation16], 4294967264 }
  0x29   :  { %3061 = dma.done.wait [#allocation19], 512  }
  0x2a   :  { %3062 = vsyncadd [#allocation19], 4294966784 }
  0x2b   :  { %3063 = dma.done.wait [#allocation22], 512  }
  0x2c   :  { %3064 = vsyncadd [#allocation22], 4294966784  ;;  %v2603_v0 = vld [vmem:[#allocation6] sm:$0xff]  ;;  %vm235_vm0 = vcmask 130048   ;;  %v2600_v2 = vld [vmem:[%s3493_s0 + $0x8] sm:$0xff]  ;;  %vm285_vm1 = vcmask 257024  }
  0x2d   :  { %v2599_v1 = vld [vmem:[%s3493_s0] sm:$0xff]  ;;  %255 = vmatpush.bf16.msra.mxu0 %v2603_v0  ;;  %v2601_v3 = vld [vmem:[%s3493_s0 + $0x10] sm:$0xff]  ;;  %v2602_v4 = vld [vmem:[%s3493_s0 + $0x18] sm:$0xff]  ;;  %vm334_vm2 = vcmask 261120   ;;  %vm531_vm3 = vcmask 523264   ;;  %s3081_s22 = smov [#allocation23]  }
  0x2e   :  { %v2605_v5 = vld [vmem:[#allocation9 + $0x8] sm:$0xff]  ;;  %v2607_v6 = vld [vmem:[#allocation11 + $0x8] sm:$0xff]  ;;  %v2604_v8 = vld [vmem:[#allocation9] sm:$0xff]  ;;  %s2146_s2 = sshll.u32 %s3081_s22, 4  ;;  %s2148_s5 = sshll.u32 %s3507_s14, 4  ;;  %s2147_s2 = int_to_ptr.vmem [resolvable:$true] %s2146_s2  ;;  %s2149_s5 = int_to_ptr.hbm [resolvable:$true] %s2148_s5 }
  0x2f   :  { %v2609_v7 = vld [vmem:[#allocation12 + $0x8] sm:$0xff]  ;;  %353 = vmatpush.bf16.msra.mxu1 %v2605_v5  ;;  %410 = vmatpush.bf16.msra.mxu2 %v2607_v6  ;;  %v2606_v9 = vld [vmem:[#allocation11] sm:$0xff]  ;;  %v2608_v10 = vld [vmem:[#allocation12] sm:$0xff] }
  0x30   :  { %2183 = vmatmul.msk.bf16.vlgmr.msra.gmra.mxu0 %vm235_vm0, %v2599_v1  ;;  %467 = vmatpush.bf16.msra.mxu3 %v2609_v7  ;;  %v498_v44 = vld [vmem:[%s3494_s1] sm:$0xf]  ;;  %v3241_v47 = vld [vmem:[#allocation14] ss:$0 sm:$0xff]  ;;  %v3245_v50 = vld [vmem:[#allocation15] ss:$0 sm:$0xff] }
  0x31   :  { %v3247_v51 = vld [vmem:[#allocation17] ss:$0 sm:$0xff]  ;;  %v2615_v6 = vld [vmem:[%s3502_s9 + $0x8] sm:$0xff] }
  0x33   :  { %354 = vmatpush.bf16.msra.mxu1 %v2604_v8  ;;  %411 = vmatpush.bf16.msra.mxu2 %v2606_v9 }
  0x34   :  { %468 = vmatpush.bf16.msra.mxu3 %v2608_v10  ;;  %v2617_v10 = vld [vmem:[#allocation18 + $0x8] sm:$0xff] }
  0x37   :  { %574 = vmatpush.bf16.msrb.mxu1 %v2615_v6  ;;  %603 = vmatpush.bf16.msrb.mxu2 %v2617_v10 }
  0x40   :  { %2184 = vmatmul.msk.bf16.gmra.mxu0 %vm235_vm0, %v2600_v2 }
  0x50   :  { %2185 = vmatmul.msk.bf16.gmra.mxu0 %vm235_vm0, %v2601_v3 }
  0x60   :  { %2186 = vmatmul.msk.bf16.gmra.mxu0 %vm235_vm0, %v2602_v4 }
  0xad   :  { %v257_v11 = vpop.f32.mrf.mxu0 }
  0xae   :  { %v277_v12 = vpack.c.bf16 %v257_v11, %v257_v11 }
  0xb0   :  { %286 = vst.msk [vmem:[#allocation2] sm:$0xf] %vm285_vm1, %v277_v12  ;;  %v310_v15 = vunpack.c.l.b16 %v277_v12 }
  0xb5   :  { %v259_v13 = vpop.f32.mrf.mxu0 }
  0xb6   :  { %v278_v14 = vpack.c.bf16 %v259_v13, %v259_v13 }
  0xb8   :  { %287 = vst.msk [vmem:[#allocation2 + $0x4] sm:$0xf] %vm285_vm1, %v278_v14  ;;  %v311_v16 = vunpack.c.l.b16 %v278_v14  ;;  %v2614_v14 = vld [vmem:[%s3502_s9] sm:$0xff] }
  0xb9   :  { %575 = vmatpush.bf16.msrb.mxu1 %v2614_v14 }
  0xba   :  { %v318_v17 = vpack.c.b16 %v311_v16, %v310_v15  ;;  %v2616_v15 = vld [vmem:[#allocation18] sm:$0xff] }
  0xbb   :  { %604 = vmatpush.bf16.msrb.mxu2 %v2616_v15 }
  0xbc   :  { %2195 = vmatmul.msk.bf16.vlgmr.msra.gmra.mxu1 %vm334_vm2, %v318_v17  ;;  %2207 = vmatmul.msk.bf16.vlgmr.msra.gmra.mxu2 %vm334_vm2, %v318_v17 }
  0xbd   :  { %2219 = vmatmul.msk.bf16.vlgmr.msra.gmra.mxu3 %vm334_vm2, %v318_v17  ;;  %v262_v18 = vpop.f32.mrf.mxu0 }
  0xbe   :  { %v279_v19 = vpack.c.bf16 %v262_v18, %v262_v18 }
  0xbf   :  { %v2610_v42 = vld [vmem:[#allocation2] sm:$0xff] }
  0xc0   :  { %288 = vst.msk [vmem:[#allocation2 + $0x8] sm:$0xf] %vm285_vm1, %v279_v19  ;;  %v312_v22 = vunpack.c.l.b16 %v279_v19 }
  0xc5   :  { %v264_v20 = vpop.f32.mrf.mxu0 }
  0xc6   :  { %v280_v21 = vpack.c.bf16 %v264_v20, %v264_v20 }
  0xc8   :  { %289 = vst.msk [vmem:[#allocation2 + $0xc] sm:$0xf] %vm285_vm1, %v280_v21  ;;  %v313_v23 = vunpack.c.l.b16 %v280_v21 }
  0xca   :  { %v319_v24 = vpack.c.b16 %v313_v23, %v312_v22 }
  0xcc   :  { %2196 = vmatmul.msk.bf16.gmra.mxu1 %vm334_vm2, %v319_v24  ;;  %2208 = vmatmul.msk.bf16.gmra.mxu2 %vm334_vm2, %v319_v24 }
  0xcd   :  { %2220 = vmatmul.msk.bf16.gmra.mxu3 %vm334_vm2, %v319_v24  ;;  %v267_v25 = vpop.f32.mrf.mxu0 }
  0xce   :  { %v281_v26 = vpack.c.bf16 %v267_v25, %v267_v25 }
  0xcf   :  { %v2611_v41 = vld [vmem:[#allocation2 + $0x8] sm:$0xff] }
  0xd0   :  { %290 = vst.msk [vmem:[#allocation2 + $0x10] sm:$0xf] %vm285_vm1, %v281_v26  ;;  %v314_v29 = vunpack.c.l.b16 %v281_v26  ;;  %v2621_v46 = vld [vmem:[#allocation2 + $0x8] sm:$0xff] }
  0xd5   :  { %v269_v27 = vpop.f32.mrf.mxu0 }
  0xd6   :  { %v282_v28 = vpack.c.bf16 %v269_v27, %v269_v27 }
  0xd8   :  { %291 = vst.msk [vmem:[#allocation2 + $0x14] sm:$0xf] %vm285_vm1, %v282_v28  ;;  %v315_v30 = vunpack.c.l.b16 %v282_v28 }
  0xda   :  { %v320_v31 = vpack.c.b16 %v315_v30, %v314_v29 }
  0xdc   :  { %2197 = vmatmul.msk.bf16.gmra.mxu1 %vm334_vm2, %v320_v31  ;;  %2209 = vmatmul.msk.bf16.gmra.mxu2 %vm334_vm2, %v320_v31 }
  0xdd   :  { %2221 = vmatmul.msk.bf16.gmra.mxu3 %vm334_vm2, %v320_v31  ;;  %v272_v32 = vpop.f32.mrf.mxu0 }
  0xde   :  { %v283_v33 = vpack.c.bf16 %v272_v32, %v272_v32 }
  0xdf   :  { %v2612_v40 = vld [vmem:[#allocation2 + $0x10] sm:$0xff] }
  0xe0   :  { %292 = vst.msk [vmem:[#allocation2 + $0x18] sm:$0xf] %vm285_vm1, %v283_v33  ;;  %v316_v36 = vunpack.c.l.b16 %v283_v33  ;;  %v2622_v45 = vld [vmem:[#allocation2 + $0x10] sm:$0xff] }
  0xe5   :  { %v274_v34 = vpop.f32.mrf.mxu0 }
  0xe6   :  { %v284_v35 = vpack.c.bf16 %v274_v34, %v274_v34 }
  0xe8   :  { %293 = vst.msk [vmem:[#allocation2 + $0x1c] sm:$0xf] %vm285_vm1, %v284_v35  ;;  %v317_v37 = vunpack.c.l.b16 %v284_v35 }
  0xea   :  { %v321_v38 = vpack.c.b16 %v317_v37, %v316_v36 }
  0xec   :  { %2198 = vmatmul.msk.bf16.gmra.mxu1 %vm334_vm2, %v321_v38  ;;  %2210 = vmatmul.msk.bf16.gmra.mxu2 %vm334_vm2, %v321_v38 }
  0xed   :  { %2222 = vmatmul.msk.bf16.gmra.mxu3 %vm334_vm2, %v321_v38 }
  0xef   :  { %v2613_v39 = vld [vmem:[#allocation2 + $0x18] sm:$0xff] }
  0xf0   :  { %539 = vmatpush.bf16.msrb.mxu0 %v2613_v39  ;;  %v2623_v43 = vld [vmem:[#allocation2 + $0x18] sm:$0xff] }
  0xf4   :  { %540 = vmatpush.bf16.msrb.mxu0 %v2612_v40 }
  0xf8   :  { %541 = vmatpush.bf16.msrb.mxu0 %v2611_v41  ;;  %v2619_v41 = vld [vmem:[#allocation20 + $0x8] sm:$0xff] }
  0xf9   :  { %680 = vmatpush.bf16.msrb.mxu3 %v2619_v41 }
  0xfc   :  { %542 = vmatpush.bf16.msrb.mxu0 %v2610_v42  ;;  %v2618_v42 = vld [vmem:[#allocation20] sm:$0xff] }
  0xfd   :  { %681 = vmatpush.bf16.msrb.mxu3 %v2618_v42 }
  0xff   :  { %2239 = vmatmul.msk.bf16.vlgmr.msrb.gmra.mxu0 %vm531_vm3, %v498_v44 }
 0x100   :  { %736 = vmatpush.bf16.msra.mxu0 %v2623_v43 }
 0x104   :  { %737 = vmatpush.bf16.msra.mxu0 %v2622_v45 }
 0x108   :  { %738 = vmatpush.bf16.msra.mxu0 %v2621_v46 }
 0x139   :  { %v356_v48 = vpop.f32.mrf.mxu1 }
 0x13a   :  { %v357_v49 = vadd.f32 %v3241_v47, %v356_v48 }
 0x13c   :  { %376 = vst.msk [vmem:[#allocation3] sm:$0xff] %vm334_vm2, %v357_v49 }
 0x13f   :  { %v413_v52 = vpop.f32.mrf.mxu2 }
 0x140   :  { %v414_v53 = vadd.f32 %v3245_v50, %v413_v52  ;;  %v470_v54 = vpop.f32.mrf.mxu3 }
 0x141   :  { %v471_v55 = vadd.f32 %v3247_v51, %v470_v54  ;;  %v358_v56 = vpop.f32.mrf.mxu1 }
 0x142   :  { %433 = vst.msk [vmem:[#allocation4] sm:$0xff] %vm334_vm2, %v414_v53  ;;  %v359_v57 = vadd.f32 %v3241_v47, %v358_v56 }
 0x143   :  { %490 = vst.msk [vmem:[#allocation5] sm:$0xff] %vm334_vm2, %v471_v55  ;;  %v610_v44 = vld [vmem:[#allocation3] sm:$0xff] }
 0x144   :  { %377 = vst.msk [vmem:[#allocation3 + $0x8] sm:$0xff] %vm334_vm2, %v359_v57 }
 0x147   :  { %v415_v58 = vpop.f32.mrf.mxu2 }
 0x148   :  { %v416_v59 = vadd.f32 %v3245_v50, %v415_v58  ;;  %v472_v60 = vpop.f32.mrf.mxu3 }
 0x149   :  { %v473_v61 = vadd.f32 %v3247_v51, %v472_v60  ;;  %v361_v62 = vpop.f32.mrf.mxu1 }
 0x14a   :  { %434 = vst.msk [vmem:[#allocation4 + $0x8] sm:$0xff] %vm334_vm2, %v416_v59  ;;  %v362_v63 = vadd.f32 %v3241_v47, %v361_v62 }
 0x14b   :  { %491 = vst.msk [vmem:[#allocation5 + $0x8] sm:$0xff] %vm334_vm2, %v473_v61 }
 0x14c   :  { %378 = vst.msk [vmem:[#allocation3 + $0x10] sm:$0xff] %vm334_vm2, %v362_v63 }
 0x14f   :  { %v418_v0 = vpop.f32.mrf.mxu2 }
 0x150   :  { %v419_v1 = vadd.f32 %v3245_v50, %v418_v0  ;;  %v475_v2 = vpop.f32.mrf.mxu3  ;;  %v631_v0 = vld [vmem:[#allocation4] sm:$0xff] }
 0x151   :  { %v476_v3 = vadd.f32 %v3247_v51, %v475_v2  ;;  %v363_v4 = vpop.f32.mrf.mxu1 }
 0x152   :  { %435 = vst.msk [vmem:[#allocation4 + $0x10] sm:$0xff] %vm334_vm2, %v419_v1  ;;  %v364_v5 = vadd.f32 %v3241_v47, %v363_v4 }
 0x153   :  { %492 = vst.msk [vmem:[#allocation5 + $0x10] sm:$0xff] %vm334_vm2, %v476_v3 }
 0x154   :  { %379 = vst.msk [vmem:[#allocation3 + $0x18] sm:$0xff] %vm334_vm2, %v364_v5 }
 0x157   :  { %v420_v7 = vpop.f32.mrf.mxu2 }
 0x158   :  { %v421_v8 = vadd.f32 %v3245_v50, %v420_v7  ;;  %v477_v9 = vpop.f32.mrf.mxu3 }
 0x159   :  { %v478_v11 = vadd.f32 %v3247_v51, %v477_v9  ;;  %v366_v12 = vpop.f32.mrf.mxu1 }
 0x15a   :  { %436 = vst.msk [vmem:[#allocation4 + $0x18] sm:$0xff] %vm334_vm2, %v421_v8  ;;  %v367_v13 = vadd.f32 %v3241_v47, %v366_v12  ;;  %v652_v12 = vld [vmem:[#allocation5] sm:$0xff] }
 0x15b   :  { %493 = vst.msk [vmem:[#allocation5 + $0x18] sm:$0xff] %vm334_vm2, %v478_v11 }
 0x15c   :  { %380 = vst.msk [vmem:[#allocation3 + $0x20] sm:$0xff] %vm334_vm2, %v367_v13 }
 0x15f   :  { %v423_v16 = vpop.f32.mrf.mxu2 }
 0x160   :  { %v424_v17 = vadd.f32 %v3245_v50, %v423_v16  ;;  %v480_v18 = vpop.f32.mrf.mxu3  ;;  %v2625_v16 = vld [vmem:[%s3502_s9 + $0x8] sm:$0xff] }
 0x161   :  { %v481_v19 = vadd.f32 %v3247_v51, %v480_v18  ;;  %v368_v20 = vpop.f32.mrf.mxu1  ;;  %771 = vmatpush.bf16.msra.mxu1 %v2625_v16 }
 0x162   :  { %437 = vst.msk [vmem:[#allocation4 + $0x20] sm:$0xff] %vm334_vm2, %v424_v17  ;;  %v369_v21 = vadd.f32 %v3241_v47, %v368_v20  ;;  %v2627_v17 = vld [vmem:[#allocation18 + $0x8] sm:$0xff] }
 0x163   :  { %494 = vst.msk [vmem:[#allocation5 + $0x20] sm:$0xff] %vm334_vm2, %v481_v19  ;;  %800 = vmatpush.bf16.msra.mxu2 %v2627_v17 }
 0x164   :  { %381 = vst.msk [vmem:[#allocation3 + $0x28] sm:$0xff] %vm334_vm2, %v369_v21 }
 0x167   :  { %v425_v22 = vpop.f32.mrf.mxu2 }
 0x168   :  { %v426_v23 = vadd.f32 %v3245_v50, %v425_v22  ;;  %v482_v24 = vpop.f32.mrf.mxu3 }
 0x169   :  { %v483_v25 = vadd.f32 %v3247_v51, %v482_v24  ;;  %v371_v26 = vpop.f32.mrf.mxu1 }
 0x16a   :  { %438 = vst.msk [vmem:[#allocation4 + $0x28] sm:$0xff] %vm334_vm2, %v426_v23  ;;  %v372_v27 = vadd.f32 %v3241_v47, %v371_v26 }
 0x16b   :  { %495 = vst.msk [vmem:[#allocation5 + $0x28] sm:$0xff] %vm334_vm2, %v483_v25 }
 0x16c   :  { %382 = vst.msk [vmem:[#allocation3 + $0x30] sm:$0xff] %vm334_vm2, %v372_v27 }
 0x16f   :  { %v428_v28 = vpop.f32.mrf.mxu2 }
 0x170   :  { %v429_v29 = vadd.f32 %v3245_v50, %v428_v28  ;;  %v485_v30 = vpop.f32.mrf.mxu3  ;;  %v2633_v28 = vld [vmem:[#allocation2 + $0x18] sm:$0xff] }
 0x171   :  { %v486_v31 = vadd.f32 %v3247_v51, %v485_v30  ;;  %v373_v32 = vpop.f32.mrf.mxu1  ;;  %v2632_v30 = vld [vmem:[#allocation2 + $0x10] sm:$0xff] }
 0x172   :  { %439 = vst.msk [vmem:[#allocation4 + $0x30] sm:$0xff] %vm334_vm2, %v429_v29  ;;  %v374_v33 = vadd.f32 %v3241_v47, %v373_v32  ;;  %v2269_v29 = vld [vmem:[%s3494_s1 + $0x4] sm:$0xf] }
 0x173   :  { %496 = vst.msk [vmem:[#allocation5 + $0x30] sm:$0xff] %vm334_vm2, %v486_v31  ;;  %v2631_v31 = vld [vmem:[#allocation2 + $0x8] sm:$0xff]  ;;  %v2624_v32 = vld [vmem:[%s3502_s9] sm:$0xff] }
 0x174   :  { %383 = vst.msk [vmem:[#allocation3 + $0x38] sm:$0xff] %vm334_vm2, %v374_v33  ;;  %v2626_v33 = vld [vmem:[#allocation18] sm:$0xff]  ;;  %772 = vmatpush.bf16.msra.mxu1 %v2624_v32 }
 0x175   :  { %801 = vmatpush.bf16.msra.mxu2 %v2626_v33  ;;  %v2639_v33 = vld [vmem:[#allocation20 + $0x8] sm:$0xff] }
 0x177   :  { %v430_v34 = vpop.f32.mrf.mxu2 }
 0x178   :  { %v431_v35 = vadd.f32 %v3245_v50, %v430_v34  ;;  %v487_v36 = vpop.f32.mrf.mxu3 }
 0x179   :  { %v488_v37 = vadd.f32 %v3247_v51, %v487_v36 }
 0x17a   :  { %440 = vst.msk [vmem:[#allocation4 + $0x38] sm:$0xff] %vm334_vm2, %v431_v35 }
 0x17b   :  { %497 = vst.msk [vmem:[#allocation5 + $0x38] sm:$0xff] %vm334_vm2, %v488_v37  ;;  %v2629_v37 = vld [vmem:[#allocation20 + $0x8] sm:$0xff] }
 0x17c   :  { %v3301_v38 = vpop.f32.mrf.mxu0  ;;  %880 = vmatpush.bf16.msra.mxu3 %v2629_v37 }
 0x17d   :  { %v548_v39 = vpack.c.bf16 %v3301_v38, %v3301_v38 }
 0x17f   :  { %2248 = vmatmul.msk.bf16.vlgmr.msrb.gmra.mxu1 %vm334_vm2, %v548_v39  ;;  %2257 = vmatmul.msk.bf16.vlgmr.msrb.gmra.mxu2 %vm334_vm2, %v548_v39 }
 0x184   :  { %v546_v40 = vpop.f32.mrf.mxu0 }
 0x185   :  { %v808_v40 = vld [vmem:[#allocation3 + $0x8] sm:$0xff] }
 0x1fc   :  { %v577_v43 = vpop.f32.mrf.mxu1 }
 0x1fd   :  { %v611_v45 = vadd.f32 %v610_v44, %v577_v43 }
 0x1ff   :  { %v2258_v46 = vmul.f32 -1.442695, %v611_v45 }
 0x201   :  { %2709 = vpow2.f32 %v2258_v46 }
 0x202   :  { %v606_v47 = vpop.f32.mrf.mxu2 }
 0x203   :  { %v632_v1 = vadd.f32 %v631_v0, %v606_v47 }
 0x204   :  { %v579_v48 = vpop.f32.mrf.mxu1 }
 0x205   :  { %v2259_v2 = vmul.f32 -1.442695, %v632_v1 }
 0x207   :  { %v2710_v49 = vpop.eup %2709 }
 0x208   :  { %v615_v50 = vadd.f32 1.0, %v2710_v49 }
 0x20a   :  { %2711 = vrcp.f32 %v615_v50  ;;  %v608_v51 = vpop.f32.mrf.mxu2  ;;  %v627_v55 = vand.u32 2147483648, %v615_v50  ;;  %v625_v57 = vand.u32 2147483647, %v615_v50  ;;  %vm621_vm5 = vweird.f32 %v615_v50 }
 0x20b   :  { %2713 = vpow2.f32 %v2259_v2 }
 0x20c   :  { %v628_v59 = vor.u32 1.1754944e-38, %v627_v55  ;;  %vm626_vm7 = vcmp.eq.f32.partialorder %v625_v57, 8.507059e+37 }
 0x210   :  { %v2712_v52 = vpop.eup %2711 }
 0x211   :  { %v617_v53 = vmul.f32 %v2712_v52, %v615_v50  ;;  %vm622_vm4 = vweird.f32 %v2712_v52  ;;  %v2714_v3 = vpop.eup %2713 }
 0x212   :  { %vm623_vm6 = vmor %vm621_vm5, %vm622_vm4  ;;  %v636_v4 = vadd.f32 1.0, %v2714_v3 }
 0x213   :  { %v618_v54 = vsub.f32 1.0, %v617_v53 }
 0x214   :  { %2715 = vrcp.f32 %v636_v4  ;;  %v648_v10 = vand.u32 2147483648, %v636_v4  ;;  %vm642_vm9 = vweird.f32 %v636_v4  ;;  %v646_v11 = vand.u32 2147483647, %v636_v4 }
 0x215   :  { %v619_v56 = vmul.f32 %v2712_v52, %v618_v54 }
 0x216   :  { %v649_v18 = vor.u32 1.1754944e-38, %v648_v10  ;;  %vm647_vm11 = vcmp.eq.f32.partialorder %v646_v11, 8.507059e+37  ;;  %v852_v10 = vld [vmem:[#allocation5 + $0x8] sm:$0xff] }
 0x217   :  { %v620_v58 = vadd.f32 %v2712_v52, %v619_v56 }
 0x219   :  { %v624_v60 = vsel %vm623_vm6, %v2712_v52, %v620_v58 }
 0x21a   :  { %v629_v61 = vsel %vm626_vm7, %v628_v59, %v624_v60  ;;  %v2716_v5 = vpop.eup %2715  ;;  %v830_v60 = vld [vmem:[#allocation4 + $0x8] sm:$0xff] }
 0x21b   :  { %v653_v62 = vmul.f32 %v629_v61, %v3301_v38  ;;  %v638_v6 = vmul.f32 %v2716_v5, %v636_v4  ;;  %vm643_vm8 = vweird.f32 %v2716_v5 }
 0x21c   :  { %vm644_vm10 = vmor %vm642_vm9, %vm643_vm8 }
 0x21d   :  { %v654_v63 = vpack.c.bf16 %v653_v62, %v653_v62  ;;  %v639_v7 = vsub.f32 1.0, %v638_v6  ;;  %v2635_v6 = vld [vmem:[%s3502_s9 + $0x8] sm:$0xff] }
 0x21e   :  { %973 = vmatpush.bf16.msrb.mxu1 %v2635_v6 }
 0x21f   :  { %2268 = vmatmul.msk.bf16.vlgmr.msrb.gmra.mxu3 %vm334_vm2, %v654_v63  ;;  %v640_v8 = vmul.f32 %v2716_v5, %v639_v7  ;;  %v2637_v7 = vld [vmem:[#allocation18 + $0x8] sm:$0xff] }
 0x220   :  { %1002 = vmatpush.bf16.msrb.mxu2 %v2637_v7 }
 0x221   :  { %v641_v9 = vadd.f32 %v2716_v5, %v640_v8 }
 0x223   :  { %v645_v15 = vsel %vm644_vm10, %v2716_v5, %v641_v9 }
 0x224   :  { %v650_v19 = vsel %vm647_vm11, %v649_v18, %v645_v15 }
 0x225   :  { %v690_v20 = vsub.f32 1.0, %v650_v19  ;;  %v689_v23 = vmul.f32 %v650_v19, %v3301_v38  ;;  %v2628_v38 = vld [vmem:[#allocation20] sm:$0xff] }
 0x226   :  { %881 = vmatpush.bf16.msra.mxu3 %v2628_v38 }
 0x22a   :  { %1082 = vmatpush.bf16.msrb.mxu3 %v2639_v33 }
 0x2a2   :  { %v683_v13 = vpop.f32.mrf.mxu3 }
 0x2a3   :  { %v687_v14 = vadd.f32 %v683_v13, %v652_v12 }
 0x2a5   :  { %2717 = vtanh.f32 %v687_v14 }
 0x2aa   :  { %v685_v21 = vpop.f32.mrf.mxu3 }
 0x2ab   :  { %v2718_v22 = vpop.eup %2717 }
 0x2ac   :  { %v691_v24 = vmul.f32 %v2718_v22, %v690_v20 }
 0x2ae   :  { %v3313_v25 = vadd.f32 %v691_v24, %v689_v23  ;;  %v2643_v24 = vld [vmem:[#allocation2 + $0x18] sm:$0xff] }
 0x2b0   :  { %v693_v26 = vpack.c.bf16 %v3313_v25, %v3313_v25 }
 0x2b2   :  { %694 = vst.msk [vmem:[#allocation2] sm:$0xf] %vm285_vm1, %v693_v26  ;;  %v2316_v26 = vld [vmem:[%s3494_s1 + $0x8] sm:$0xf] }
 0x2b9   :  { %v2620_v27 = vld [vmem:[#allocation2] sm:$0xff] }
 0x2ba   :  { %739 = vmatpush.bf16.msra.mxu0 %v2620_v27  ;;  %v2642_v27 = vld [vmem:[#allocation2 + $0x10] sm:$0xff] }
 0x2bd   :  { %2286 = vmatmul.msk.bf16.vlgmr.msra.gmra.mxu0 %vm531_vm3, %v2269_v29  ;;  %v2636_v29 = vld [vmem:[#allocation18] sm:$0xff] }
 0x2be   :  { %938 = vmatpush.bf16.msrb.mxu0 %v2633_v28  ;;  %v2634_v28 = vld [vmem:[%s3502_s9] sm:$0xff]  ;;  %1003 = vmatpush.bf16.msrb.mxu2 %v2636_v29 }
 0x2bf   :  { %974 = vmatpush.bf16.msrb.mxu1 %v2634_v28 }
 0x2c2   :  { %939 = vmatpush.bf16.msrb.mxu0 %v2632_v30 }
 0x2c6   :  { %940 = vmatpush.bf16.msrb.mxu0 %v2631_v31 }
 0x33a   :  { %v3325_v34 = vpop.f32.mrf.mxu0 }
 0x33b   :  { %v745_v35 = vpack.c.bf16 %v3325_v34, %v3325_v34 }
 0x33d   :  { %2295 = vmatmul.msk.bf16.vlgmr.msra.gmra.mxu1 %vm334_vm2, %v745_v35  ;;  %2304 = vmatmul.msk.bf16.vlgmr.msra.gmra.mxu2 %vm334_vm2, %v745_v35 }
 0x342   :  { %v743_v36 = vpop.f32.mrf.mxu0 }
 0x343   :  { %v1010_v36 = vld [vmem:[#allocation3 + $0x10] sm:$0xff] }
 0x3ba   :  { %v774_v39 = vpop.f32.mrf.mxu1 }
 0x3bb   :  { %v809_v41 = vadd.f32 %v808_v40, %v774_v39 }
 0x3bd   :  { %v2305_v42 = vmul.f32 -1.442695, %v809_v41 }
 0x3bf   :  { %2719 = vpow2.f32 %v2305_v42 }
 0x3c0   :  { %v803_v43 = vpop.f32.mrf.mxu2 }
 0x3c1   :  { %v831_v61 = vadd.f32 %v830_v60, %v803_v43 }
 0x3c2   :  { %v776_v44 = vpop.f32.mrf.mxu1 }
 0x3c3   :  { %v2306_v62 = vmul.f32 -1.442695, %v831_v61 }
 0x3c5   :  { %v2720_v45 = vpop.eup %2719 }
 0x3c6   :  { %v813_v46 = vadd.f32 1.0, %v2720_v45 }
 0x3c8   :  { %2721 = vrcp.f32 %v813_v46  ;;  %v805_v47 = vpop.f32.mrf.mxu2  ;;  %v825_v51 = vand.u32 2147483648, %v813_v46  ;;  %v823_v53 = vand.u32 2147483647, %v813_v46  ;;  %vm819_vm13 = vweird.f32 %v813_v46 }
 0x3c9   :  { %2723 = vpow2.f32 %v2306_v62 }
 0x3ca   :  { %v826_v55 = vor.u32 1.1754944e-38, %v825_v51  ;;  %vm824_vm15 = vcmp.eq.f32.partialorder %v823_v53, 8.507059e+37 }
 0x3ce   :  { %v2722_v48 = vpop.eup %2721 }
 0x3cf   :  { %v815_v49 = vmul.f32 %v2722_v48, %v813_v46  ;;  %vm820_vm12 = vweird.f32 %v2722_v48  ;;  %v2724_v63 = vpop.eup %2723 }
 0x3d0   :  { %vm821_vm14 = vmor %vm819_vm13, %vm820_vm12  ;;  %v835_v0 = vadd.f32 1.0, %v2724_v63 }
 0x3d1   :  { %v816_v50 = vsub.f32 1.0, %v815_v49 }
 0x3d2   :  { %2725 = vrcp.f32 %v835_v0  ;;  %v847_v8 = vand.u32 2147483648, %v835_v0  ;;  %vm841_vm4 = vweird.f32 %v835_v0  ;;  %v845_v9 = vand.u32 2147483647, %v835_v0 }
 0x3d3   :  { %v817_v52 = vmul.f32 %v2722_v48, %v816_v50 }
 0x3d4   :  { %v848_v14 = vor.u32 1.1754944e-38, %v847_v8  ;;  %vm846_vm6 = vcmp.eq.f32.partialorder %v845_v9, 8.507059e+37  ;;  %v2645_v8 = vld [vmem:[%s3502_s9 + $0x8] sm:$0xff] }
 0x3d5   :  { %v818_v54 = vadd.f32 %v2722_v48, %v817_v52  ;;  %v2647_v9 = vld [vmem:[#allocation18 + $0x8] sm:$0xff]  ;;  %1175 = vmatpush.bf16.msra.mxu1 %v2645_v8 }
 0x3d6   :  { %1204 = vmatpush.bf16.msra.mxu2 %v2647_v9 }
 0x3d7   :  { %v822_v56 = vsel %vm821_vm14, %v2722_v48, %v818_v54 }
 0x3d8   :  { %v827_v57 = vsel %vm824_vm15, %v826_v55, %v822_v56  ;;  %v2726_v1 = vpop.eup %2725  ;;  %v1032_v56 = vld [vmem:[#allocation4 + $0x10] sm:$0xff] }
 0x3d9   :  { %v853_v58 = vmul.f32 %v827_v57, %v3325_v34  ;;  %v837_v2 = vmul.f32 %v2726_v1, %v835_v0  ;;  %vm842_vm0 = vweird.f32 %v2726_v1 }
 0x3da   :  { %vm843_vm5 = vmor %vm841_vm4, %vm842_vm0 }
 0x3db   :  { %v854_v59 = vpack.c.bf16 %v853_v58, %v853_v58  ;;  %v838_v3 = vsub.f32 1.0, %v837_v2 }
 0x3dd   :  { %2315 = vmatmul.msk.bf16.vlgmr.msra.gmra.mxu3 %vm334_vm2, %v854_v59  ;;  %v839_v4 = vmul.f32 %v2726_v1, %v838_v3 }
 0x3df   :  { %v840_v5 = vadd.f32 %v2726_v1, %v839_v4  ;;  %v1054_v4 = vld [vmem:[#allocation5 + $0x10] sm:$0xff] }
 0x3e1   :  { %v844_v13 = vsel %vm843_vm5, %v2726_v1, %v840_v5 }
 0x3e2   :  { %v849_v15 = vsel %vm846_vm6, %v848_v14, %v844_v13 }
 0x3e3   :  { %v890_v16 = vsub.f32 1.0, %v849_v15  ;;  %v889_v19 = vmul.f32 %v849_v15, %v3325_v34  ;;  %v2638_v34 = vld [vmem:[#allocation20] sm:$0xff] }
 0x3e4   :  { %1083 = vmatpush.bf16.msrb.mxu3 %v2638_v34  ;;  %v1212_v34 = vld [vmem:[#allocation3 + $0x18] sm:$0xff] }
 0x460   :  { %v883_v11 = vpop.f32.mrf.mxu3 }
 0x461   :  { %v887_v12 = vadd.f32 %v883_v11, %v852_v10 }
 0x463   :  { %2727 = vtanh.f32 %v887_v12 }
 0x468   :  { %v885_v17 = vpop.f32.mrf.mxu3 }
 0x469   :  { %v2728_v18 = vpop.eup %2727 }
 0x46a   :  { %v891_v20 = vmul.f32 %v2728_v18, %v890_v16 }
 0x46c   :  { %v3337_v21 = vadd.f32 %v891_v20, %v889_v19 }
 0x46e   :  { %v893_v22 = vpack.c.bf16 %v3337_v21, %v3337_v21  ;;  %v896_v17 = vmax.f32 %v3313_v25, %v3337_v21  ;;  %v2644_v25 = vld [vmem:[%s3502_s9] sm:$0xff] }
 0x46f   :  { %v2646_v21 = vld [vmem:[#allocation18] sm:$0xff]  ;;  %1176 = vmatpush.bf16.msra.mxu1 %v2644_v25 }
 0x470   :  { %895 = vst.msk [vmem:[#allocation2 + $0x4] sm:$0xf] %vm285_vm1, %v893_v22  ;;  %1205 = vmatpush.bf16.msra.mxu2 %v2646_v21 }
 0x477   :  { %v2630_v23 = vld [vmem:[#allocation2] sm:$0xff] }
 0x478   :  { %941 = vmatpush.bf16.msrb.mxu0 %v2630_v23  ;;  %v2640_v23 = vld [vmem:[#allocation2] sm:$0xff] }
 0x47b   :  { %2333 = vmatmul.msk.bf16.vlgmr.msrb.gmra.mxu0 %vm531_vm3, %v2316_v26  ;;  %v2363_v26 = vld [vmem:[%s3494_s1 + $0xc] sm:$0xf] }
 0x47c   :  { %1140 = vmatpush.bf16.msra.mxu0 %v2643_v24  ;;  %v2653_v24 = vld [vmem:[#allocation2 + $0x18] sm:$0xff] }
 0x480   :  { %1141 = vmatpush.bf16.msra.mxu0 %v2642_v27  ;;  %v2652_v27 = vld [vmem:[#allocation2 + $0x10] sm:$0xff] }
 0x4f8   :  { %v3349_v30 = vpop.f32.mrf.mxu0 }
 0x4f9   :  { %v947_v31 = vpack.c.bf16 %v3349_v30, %v3349_v30 }
 0x4fb   :  { %2342 = vmatmul.msk.bf16.vlgmr.msrb.gmra.mxu1 %vm334_vm2, %v947_v31  ;;  %2351 = vmatmul.msk.bf16.vlgmr.msrb.gmra.mxu2 %vm334_vm2, %v947_v31  ;;  %v2649_v31 = vld [vmem:[#allocation20 + $0x8] sm:$0xff] }
 0x4fc   :  { %1284 = vmatpush.bf16.msra.mxu3 %v2649_v31  ;;  %v1414_v31 = vld [vmem:[#allocation3 + $0x20] sm:$0xff] }
 0x500   :  { %v945_v32 = vpop.f32.mrf.mxu0 }
 0x501   :  { %v2648_v32 = vld [vmem:[#allocation20] sm:$0xff] }
 0x502   :  { %1285 = vmatpush.bf16.msra.mxu3 %v2648_v32 }
 0x578   :  { %v976_v35 = vpop.f32.mrf.mxu1 }
 0x579   :  { %v1011_v37 = vadd.f32 %v1010_v36, %v976_v35 }
 0x57b   :  { %v2352_v38 = vmul.f32 -1.442695, %v1011_v37 }
 0x57d   :  { %2729 = vpow2.f32 %v2352_v38 }
 0x57e   :  { %v1005_v39 = vpop.f32.mrf.mxu2 }
 0x57f   :  { %v1033_v57 = vadd.f32 %v1032_v56, %v1005_v39 }
 0x580   :  { %v978_v40 = vpop.f32.mrf.mxu1 }
 0x581   :  { %v2353_v58 = vmul.f32 -1.442695, %v1033_v57 }
 0x583   :  { %v2730_v41 = vpop.eup %2729 }
 0x584   :  { %v1015_v42 = vadd.f32 1.0, %v2730_v41 }
 0x586   :  { %2731 = vrcp.f32 %v1015_v42  ;;  %v1007_v43 = vpop.f32.mrf.mxu2  ;;  %v1027_v47 = vand.u32 2147483648, %v1015_v42  ;;  %v1025_v49 = vand.u32 2147483647, %v1015_v42  ;;  %vm1021_vm8 = vweird.f32 %v1015_v42 }
 0x587   :  { %2733 = vpow2.f32 %v2353_v58 }
 0x588   :  { %v1028_v51 = vor.u32 1.1754944e-38, %v1027_v47  ;;  %vm1026_vm10 = vcmp.eq.f32.partialorder %v1025_v49, 8.507059e+37 }
 0x58c   :  { %v2732_v44 = vpop.eup %2731 }
 0x58d   :  { %v1017_v45 = vmul.f32 %v2732_v44, %v1015_v42  ;;  %vm1022_vm7 = vweird.f32 %v2732_v44  ;;  %v2734_v59 = vpop.eup %2733 }
 0x58e   :  { %vm1023_vm9 = vmor %vm1021_vm8, %vm1022_vm7  ;;  %v1037_v60 = vadd.f32 1.0, %v2734_v59 }
 0x58f   :  { %v1018_v46 = vsub.f32 1.0, %v1017_v45 }
 0x590   :  { %2735 = vrcp.f32 %v1037_v60  ;;  %v1049_v2 = vand.u32 2147483648, %v1037_v60  ;;  %vm1043_vm12 = vweird.f32 %v1037_v60  ;;  %v1047_v3 = vand.u32 2147483647, %v1037_v60 }
 0x591   :  { %v1019_v48 = vmul.f32 %v2732_v44, %v1018_v46 }
 0x592   :  { %v1050_v10 = vor.u32 1.1754944e-38, %v1049_v2  ;;  %vm1048_vm14 = vcmp.eq.f32.partialorder %v1047_v3, 8.507059e+37  ;;  %v1256_v2 = vld [vmem:[#allocation5 + $0x18] sm:$0xff] }
 0x593   :  { %v1020_v50 = vadd.f32 %v2732_v44, %v1019_v48 }
 0x595   :  { %v1024_v52 = vsel %vm1023_vm9, %v2732_v44, %v1020_v50 }
 0x596   :  { %v1029_v53 = vsel %vm1026_vm10, %v1028_v51, %v1024_v52  ;;  %v2736_v61 = vpop.eup %2735 }
 0x597   :  { %v1055_v54 = vmul.f32 %v1029_v53, %v3349_v30  ;;  %v1039_v62 = vmul.f32 %v2736_v61, %v1037_v60  ;;  %vm1044_vm11 = vweird.f32 %v2736_v61 }
 0x598   :  { %vm1045_vm13 = vmor %vm1043_vm12, %vm1044_vm11 }
 0x599   :  { %v1056_v55 = vpack.c.bf16 %v1055_v54, %v1055_v54  ;;  %v1040_v63 = vsub.f32 1.0, %v1039_v62  ;;  %v1234_v54 = vld [vmem:[#allocation4 + $0x18] sm:$0xff] }
 0x59b   :  { %2362 = vmatmul.msk.bf16.vlgmr.msrb.gmra.mxu3 %vm334_vm2, %v1056_v55  ;;  %v1041_v0 = vmul.f32 %v2736_v61, %v1040_v63 }
 0x59d   :  { %v1042_v1 = vadd.f32 %v2736_v61, %v1041_v0 }
 0x59f   :  { %v1046_v7 = vsel %vm1045_vm13, %v2736_v61, %v1042_v1 }
 0x5a0   :  { %v1051_v11 = vsel %vm1048_vm14, %v1050_v10, %v1046_v7 }
 0x5a1   :  { %v1092_v12 = vsub.f32 1.0, %v1051_v11  ;;  %v1091_v15 = vmul.f32 %v1051_v11, %v3349_v30 }
 0x61e   :  { %v1085_v5 = vpop.f32.mrf.mxu3 }
 0x61f   :  { %v1089_v6 = vadd.f32 %v1085_v5, %v1054_v4  ;;  %v2655_v4 = vld [vmem:[%s3502_s9 + $0x8] sm:$0xff] }
 0x620   :  { %v2657_v5 = vld [vmem:[#allocation18 + $0x8] sm:$0xff]  ;;  %1377 = vmatpush.bf16.msrb.mxu1 %v2655_v4 }
 0x621   :  { %2737 = vtanh.f32 %v1089_v6  ;;  %1406 = vmatpush.bf16.msrb.mxu2 %v2657_v5  ;;  %v2665_v4 = vld [vmem:[%s3502_s9 + $0x8] sm:$0xff] }
 0x622   :  { %v2667_v5 = vld [vmem:[#allocation18 + $0x8] sm:$0xff] }
 0x626   :  { %v1087_v13 = vpop.f32.mrf.mxu3 }
 0x627   :  { %v2738_v14 = vpop.eup %2737 }
 0x628   :  { %v1093_v16 = vmul.f32 %v2738_v14, %v1092_v12 }
 0x62a   :  { %v1094_v18 = vadd.f32 %v1093_v16, %v1091_v15 }
 0x62c   :  { %v1095_v19 = vpack.c.bf16 %v1094_v18, %v1094_v18  ;;  %v3363_v20 = vmax.f32 %v896_v17, %v1094_v18 }
 0x62e   :  { %1097 = vst.msk [vmem:[#allocation2 + $0x8] sm:$0xf] %vm285_vm1, %v1095_v19  ;;  %v2650_v19 = vld [vmem:[#allocation2] sm:$0xff] }
 0x635   :  { %v2641_v22 = vld [vmem:[#allocation2 + $0x8] sm:$0xff] }
 0x636   :  { %1142 = vmatpush.bf16.msra.mxu0 %v2641_v22  ;;  %v2663_v22 = vld [vmem:[#allocation2 + $0x18] sm:$0xff] }
 0x63a   :  { %1143 = vmatpush.bf16.msra.mxu0 %v2640_v23  ;;  %v2410_v23 = vld [vmem:[%s3494_s1 + $0x10] sm:$0xf] }
 0x63d   :  { %2380 = vmatmul.msk.bf16.vlgmr.msra.gmra.mxu0 %vm531_vm3, %v2363_v26  ;;  %v2656_v26 = vld [vmem:[#allocation18] sm:$0xff] }
 0x63e   :  { %1342 = vmatpush.bf16.msrb.mxu0 %v2653_v24  ;;  %v2654_v24 = vld [vmem:[%s3502_s9] sm:$0xff]  ;;  %1407 = vmatpush.bf16.msrb.mxu2 %v2656_v26 }
 0x63f   :  { %1378 = vmatpush.bf16.msrb.mxu1 %v2654_v24 }
 0x642   :  { %1343 = vmatpush.bf16.msrb.mxu0 %v2652_v27 }
 0x6ba   :  { %v3373_v28 = vpop.f32.mrf.mxu0 }
 0x6bb   :  { %v1149_v29 = vpack.c.bf16 %v3373_v28, %v3373_v28 }
 0x6bd   :  { %2389 = vmatmul.msk.bf16.vlgmr.msra.gmra.mxu1 %vm334_vm2, %v1149_v29  ;;  %2398 = vmatmul.msk.bf16.vlgmr.msra.gmra.mxu2 %vm334_vm2, %v1149_v29  ;;  %v2658_v29 = vld [vmem:[#allocation20] sm:$0xff] }
 0x6be   :  { %1579 = vmatpush.bf16.msra.mxu1 %v2665_v4  ;;  %1608 = vmatpush.bf16.msra.mxu2 %v2667_v5 }
 0x6c2   :  { %v1147_v30 = vpop.f32.mrf.mxu0 }
 0x73a   :  { %v1178_v33 = vpop.f32.mrf.mxu1 }
 0x73b   :  { %v1213_v35 = vadd.f32 %v1212_v34, %v1178_v33 }
 0x73d   :  { %v2399_v36 = vmul.f32 -1.442695, %v1213_v35 }
 0x73f   :  { %2739 = vpow2.f32 %v2399_v36 }
 0x740   :  { %v1207_v37 = vpop.f32.mrf.mxu2 }
 0x741   :  { %v1235_v55 = vadd.f32 %v1234_v54, %v1207_v37 }
 0x742   :  { %v1180_v38 = vpop.f32.mrf.mxu1 }
 0x743   :  { %v2400_v56 = vmul.f32 -1.442695, %v1235_v55 }
 0x745   :  { %v2740_v39 = vpop.eup %2739 }
 0x746   :  { %v1217_v40 = vadd.f32 1.0, %v2740_v39 }
 0x748   :  { %2741 = vrcp.f32 %v1217_v40  ;;  %v1209_v41 = vpop.f32.mrf.mxu2  ;;  %v1229_v45 = vand.u32 2147483648, %v1217_v40  ;;  %v1227_v47 = vand.u32 2147483647, %v1217_v40  ;;  %vm1223_vm0 = vweird.f32 %v1217_v40 }
 0x749   :  { %2743 = vpow2.f32 %v2400_v56 }
 0x74a   :  { %v1230_v49 = vor.u32 1.1754944e-38, %v1229_v45  ;;  %vm1228_vm5 = vcmp.eq.f32.partialorder %v1227_v47, 8.507059e+37 }
 0x74e   :  { %v2742_v42 = vpop.eup %2741 }
 0x74f   :  { %v1219_v43 = vmul.f32 %v2742_v42, %v1217_v40  ;;  %vm1224_vm15 = vweird.f32 %v2742_v42  ;;  %v2744_v57 = vpop.eup %2743 }
 0x750   :  { %vm1225_vm4 = vmor %vm1223_vm0, %vm1224_vm15  ;;  %v1239_v58 = vadd.f32 1.0, %v2744_v57 }
 0x751   :  { %v1220_v44 = vsub.f32 1.0, %v1219_v43 }
 0x752   :  { %2745 = vrcp.f32 %v1239_v58  ;;  %v1251_v0 = vand.u32 2147483648, %v1239_v58  ;;  %vm1245_vm7 = vweird.f32 %v1239_v58  ;;  %v1249_v1 = vand.u32 2147483647, %v1239_v58 }
 0x753   :  { %v1221_v46 = vmul.f32 %v2742_v42, %v1220_v44 }
 0x754   :  { %v1252_v8 = vor.u32 1.1754944e-38, %v1251_v0  ;;  %vm1250_vm9 = vcmp.eq.f32.partialorder %v1249_v1, 8.507059e+37 }
 0x755   :  { %v1222_v48 = vadd.f32 %v2742_v42, %v1221_v46 }
 0x757   :  { %v1226_v50 = vsel %vm1225_vm4, %v2742_v42, %v1222_v48 }
 0x758   :  { %v1231_v51 = vsel %vm1228_vm5, %v1230_v49, %v1226_v50  ;;  %v2746_v59 = vpop.eup %2745 }
 0x759   :  { %v1257_v52 = vmul.f32 %v1231_v51, %v3373_v28  ;;  %v1241_v60 = vmul.f32 %v2746_v59, %v1239_v58  ;;  %vm1246_vm6 = vweird.f32 %v2746_v59  ;;  %v1436_v51 = vld [vmem:[#allocation4 + $0x20] sm:$0xff] }
 0x75a   :  { %vm1247_vm8 = vmor %vm1245_vm7, %vm1246_vm6 }
 0x75b   :  { %v1258_v53 = vpack.c.bf16 %v1257_v52, %v1257_v52  ;;  %v1242_v61 = vsub.f32 1.0, %v1241_v60 }
 0x75d   :  { %2409 = vmatmul.msk.bf16.vlgmr.msra.gmra.mxu3 %vm334_vm2, %v1258_v53  ;;  %v1243_v62 = vmul.f32 %v2746_v59, %v1242_v61 }
 0x75f   :  { %v1244_v63 = vadd.f32 %v2746_v59, %v1243_v62 }
 0x761   :  { %v1248_v7 = vsel %vm1247_vm8, %v2746_v59, %v1244_v63  ;;  %v1458_v63 = vld [vmem:[#allocation5 + $0x20] sm:$0xff] }
 0x762   :  { %v1253_v9 = vsel %vm1250_vm9, %v1252_v8, %v1248_v7 }
 0x763   :  { %v1294_v10 = vsub.f32 1.0, %v1253_v9  ;;  %v1293_v13 = vmul.f32 %v1253_v9, %v3373_v28  ;;  %v2659_v28 = vld [vmem:[#allocation20 + $0x8] sm:$0xff] }
 0x764   :  { %1486 = vmatpush.bf16.msrb.mxu3 %v2659_v28  ;;  %v1616_v28 = vld [vmem:[#allocation3 + $0x28] sm:$0xff] }
 0x768   :  { %1487 = vmatpush.bf16.msrb.mxu3 %v2658_v29 }
 0x7e0   :  { %v1287_v3 = vpop.f32.mrf.mxu3 }
 0x7e1   :  { %v1291_v6 = vadd.f32 %v1287_v3, %v1256_v2 }
 0x7e3   :  { %2747 = vtanh.f32 %v1291_v6 }
 0x7e8   :  { %v1289_v11 = vpop.f32.mrf.mxu3 }
 0x7e9   :  { %v2748_v12 = vpop.eup %2747 }
 0x7ea   :  { %v1295_v14 = vmul.f32 %v2748_v12, %v1294_v10 }
 0x7ec   :  { %v3385_v15 = vadd.f32 %v1295_v14, %v1293_v13 }
 0x7ee   :  { %v1297_v16 = vpack.c.bf16 %v3385_v15, %v3385_v15  ;;  %v1300_v17 = vmax.f32 %v3363_v20, %v3385_v15  ;;  %v2664_v20 = vld [vmem:[%s3502_s9] sm:$0xff] }
 0x7ef   :  { %v2666_v15 = vld [vmem:[#allocation18] sm:$0xff]  ;;  %1580 = vmatpush.bf16.msra.mxu1 %v2664_v20 }
 0x7f0   :  { %1299 = vst.msk [vmem:[#allocation2 + $0xc] sm:$0xf] %vm285_vm1, %v1297_v16  ;;  %1609 = vmatpush.bf16.msra.mxu2 %v2666_v15 }
 0x7f7   :  { %v2651_v18 = vld [vmem:[#allocation2 + $0x8] sm:$0xff] }
 0x7f8   :  { %1344 = vmatpush.bf16.msrb.mxu0 %v2651_v18  ;;  %v2661_v18 = vld [vmem:[#allocation2 + $0x8] sm:$0xff] }
 0x7fc   :  { %1345 = vmatpush.bf16.msrb.mxu0 %v2650_v19  ;;  %v2660_v19 = vld [vmem:[#allocation2] sm:$0xff] }
 0x7ff   :  { %2427 = vmatmul.msk.bf16.vlgmr.msrb.gmra.mxu0 %vm531_vm3, %v2410_v23  ;;  %v2457_v23 = vld [vmem:[%s3494_s1 + $0x14] sm:$0xf] }
 0x800   :  { %1544 = vmatpush.bf16.msra.mxu0 %v2663_v22  ;;  %v2673_v22 = vld [vmem:[#allocation2 + $0x18] sm:$0xff] }
 0x87c   :  { %v3399_v27 = vpop.f32.mrf.mxu0 }
 0x87d   :  { %v1351_v25 = vpack.c.bf16 %v3399_v27, %v3399_v27 }
 0x87f   :  { %2436 = vmatmul.msk.bf16.vlgmr.msrb.gmra.mxu1 %vm334_vm2, %v1351_v25  ;;  %2445 = vmatmul.msk.bf16.vlgmr.msrb.gmra.mxu2 %vm334_vm2, %v1351_v25  ;;  %v2668_v25 = vld [vmem:[#allocation20] sm:$0xff] }
 0x884   :  { %v1349_v21 = vpop.f32.mrf.mxu0 }
 0x8fc   :  { %v1380_v30 = vpop.f32.mrf.mxu1 }
 0x8fd   :  { %v1415_v32 = vadd.f32 %v1414_v31, %v1380_v30 }
 0x8ff   :  { %v2446_v33 = vmul.f32 -1.442695, %v1415_v32 }
 0x901   :  { %2749 = vpow2.f32 %v2446_v33 }
 0x902   :  { %v1409_v34 = vpop.f32.mrf.mxu2 }
 0x903   :  { %v1437_v52 = vadd.f32 %v1436_v51, %v1409_v34 }
 0x904   :  { %v1382_v35 = vpop.f32.mrf.mxu1 }
 0x905   :  { %v2447_v53 = vmul.f32 -1.442695, %v1437_v52 }
 0x907   :  { %v2750_v36 = vpop.eup %2749 }
 0x908   :  { %v1419_v37 = vadd.f32 1.0, %v2750_v36 }
 0x90a   :  { %2751 = vrcp.f32 %v1419_v37  ;;  %v1411_v38 = vpop.f32.mrf.mxu2  ;;  %v1431_v42 = vand.u32 2147483648, %v1419_v37  ;;  %v1429_v44 = vand.u32 2147483647, %v1419_v37  ;;  %vm1425_vm11 = vweird.f32 %v1419_v37 }
 0x90b   :  { %2753 = vpow2.f32 %v2447_v53 }
 0x90c   :  { %v1432_v46 = vor.u32 1.1754944e-38, %v1431_v42  ;;  %vm1430_vm13 = vcmp.eq.f32.partialorder %v1429_v44, 8.507059e+37 }
 0x910   :  { %v2752_v39 = vpop.eup %2751 }
 0x911   :  { %v1421_v40 = vmul.f32 %v2752_v39, %v1419_v37  ;;  %vm1426_vm10 = vweird.f32 %v2752_v39  ;;  %v2754_v54 = vpop.eup %2753 }
 0x912   :  { %vm1427_vm12 = vmor %vm1425_vm11, %vm1426_vm10  ;;  %v1441_v55 = vadd.f32 1.0, %v2754_v54 }
 0x913   :  { %v1422_v41 = vsub.f32 1.0, %v1421_v40 }
 0x914   :  { %2755 = vrcp.f32 %v1441_v55  ;;  %v1453_v61 = vand.u32 2147483648, %v1441_v55  ;;  %vm1447_vm15 = vweird.f32 %v1441_v55  ;;  %v1451_v62 = vand.u32 2147483647, %v1441_v55 }
 0x915   :  { %v1423_v43 = vmul.f32 %v2752_v39, %v1422_v41 }
 0x916   :  { %v1454_v3 = vor.u32 1.1754944e-38, %v1453_v61  ;;  %vm1452_vm4 = vcmp.eq.f32.partialorder %v1451_v62, 8.507059e+37 }
 0x917   :  { %v1424_v45 = vadd.f32 %v2752_v39, %v1423_v43 }
 0x919   :  { %v1428_v47 = vsel %vm1427_vm12, %v2752_v39, %v1424_v45 }
 0x91a   :  { %v1433_v48 = vsel %vm1430_vm13, %v1432_v46, %v1428_v47  ;;  %v2756_v56 = vpop.eup %2755 }
 0x91b   :  { %v1459_v49 = vmul.f32 %v1433_v48, %v3399_v27  ;;  %v1443_v57 = vmul.f32 %v2756_v56, %v1441_v55  ;;  %vm1448_vm14 = vweird.f32 %v2756_v56  ;;  %v1638_v48 = vld [vmem:[#allocation4 + $0x28] sm:$0xff] }
 0x91c   :  { %vm1449_vm0 = vmor %vm1447_vm15, %vm1448_vm14 }
 0x91d   :  { %v1460_v50 = vpack.c.bf16 %v1459_v49, %v1459_v49  ;;  %v1444_v58 = vsub.f32 1.0, %v1443_v57 }
 0x91f   :  { %2456 = vmatmul.msk.bf16.vlgmr.msrb.gmra.mxu3 %vm334_vm2, %v1460_v50  ;;  %v1445_v59 = vmul.f32 %v2756_v56, %v1444_v58 }
 0x921   :  { %v1446_v60 = vadd.f32 %v2756_v56, %v1445_v59 }
 0x923   :  { %v1450_v2 = vsel %vm1449_vm0, %v2756_v56, %v1446_v60  ;;  %v1660_v60 = vld [vmem:[#allocation5 + $0x28] sm:$0xff] }
 0x924   :  { %v1455_v6 = vsel %vm1452_vm4, %v1454_v3, %v1450_v2  ;;  %v2677_v2 = vld [vmem:[#allocation18 + $0x8] sm:$0xff] }
 0x925   :  { %v1496_v7 = vsub.f32 1.0, %v1455_v6  ;;  %v1495_v10 = vmul.f32 %v1455_v6, %v3399_v27  ;;  %v2669_v27 = vld [vmem:[#allocation20 + $0x8] sm:$0xff]  ;;  %1810 = vmatpush.bf16.msrb.mxu2 %v2677_v2  ;;  %v2687_v2 = vld [vmem:[#allocation18 + $0x8] sm:$0xff] }
 0x926   :  { %1688 = vmatpush.bf16.msra.mxu3 %v2669_v27  ;;  %v1818_v27 = vld [vmem:[#allocation3 + $0x30] sm:$0xff] }
 0x92a   :  { %1689 = vmatpush.bf16.msra.mxu3 %v2668_v25 }
 0x9a2   :  { %v1489_v0 = vpop.f32.mrf.mxu3 }
 0x9a3   :  { %v1493_v1 = vadd.f32 %v1489_v0, %v1458_v63 }
 0x9a5   :  { %2757 = vtanh.f32 %v1493_v1  ;;  %v2675_v1 = vld [vmem:[%s3502_s9 + $0x8] sm:$0xff] }
 0x9a6   :  { %1781 = vmatpush.bf16.msrb.mxu1 %v2675_v1  ;;  %v2685_v1 = vld [vmem:[%s3502_s9 + $0x8] sm:$0xff] }
 0x9aa   :  { %v1491_v8 = vpop.f32.mrf.mxu3 }
 0x9ab   :  { %v2758_v9 = vpop.eup %2757 }
 0x9ac   :  { %v1497_v11 = vmul.f32 %v2758_v9, %v1496_v7 }
 0x9ae   :  { %v1498_v12 = vadd.f32 %v1497_v11, %v1495_v10 }
 0x9b0   :  { %v1499_v13 = vpack.c.bf16 %v1498_v12, %v1498_v12  ;;  %v3414_v14 = vmax.f32 %v1300_v17, %v1498_v12 }
 0x9b2   :  { %1501 = vst.msk [vmem:[#allocation2 + $0x10] sm:$0xf] %vm285_vm1, %v1499_v13  ;;  %v2671_v13 = vld [vmem:[#allocation2 + $0x8] sm:$0xff] }
 0x9b9   :  { %v2662_v16 = vld [vmem:[#allocation2 + $0x10] sm:$0xff] }
 0x9ba   :  { %1545 = vmatpush.bf16.msra.mxu0 %v2662_v16  ;;  %v2670_v16 = vld [vmem:[#allocation2] sm:$0xff] }
 0x9be   :  { %1546 = vmatpush.bf16.msra.mxu0 %v2661_v18  ;;  %v2504_v18 = vld [vmem:[%s3494_s1 + $0x18] sm:$0xf] }
 0x9c2   :  { %1547 = vmatpush.bf16.msra.mxu0 %v2660_v19  ;;  %v2674_v19 = vld [vmem:[%s3502_s9] sm:$0xff] }
 0x9c3   :  { %1782 = vmatpush.bf16.msrb.mxu1 %v2674_v19 }
 0x9c5   :  { %2474 = vmatmul.msk.bf16.vlgmr.msra.gmra.mxu0 %vm531_vm3, %v2457_v23 }
 0x9c6   :  { %1746 = vmatpush.bf16.msrb.mxu0 %v2673_v22  ;;  %v2676_v22 = vld [vmem:[#allocation18] sm:$0xff] }
 0x9c7   :  { %1811 = vmatpush.bf16.msrb.mxu2 %v2676_v22 }
 0xa42   :  { %v3424_v17 = vpop.f32.mrf.mxu0 }
 0xa43   :  { %v1553_v24 = vpack.c.bf16 %v3424_v17, %v3424_v17 }
 0xa45   :  { %2483 = vmatmul.msk.bf16.vlgmr.msra.gmra.mxu1 %vm334_vm2, %v1553_v24  ;;  %2492 = vmatmul.msk.bf16.vlgmr.msra.gmra.mxu2 %vm334_vm2, %v1553_v24  ;;  %v2678_v24 = vld [vmem:[#allocation20] sm:$0xff] }
 0xa46   :  { %1983 = vmatpush.bf16.msra.mxu1 %v2685_v1  ;;  %2012 = vmatpush.bf16.msra.mxu2 %v2687_v2 }
 0xa4a   :  { %v1551_v26 = vpop.f32.mrf.mxu0 }
 0xac2   :  { %v1582_v21 = vpop.f32.mrf.mxu1 }
 0xac3   :  { %v1617_v29 = vadd.f32 %v1616_v28, %v1582_v21 }
 0xac5   :  { %v2493_v30 = vmul.f32 -1.442695, %v1617_v29 }
 0xac7   :  { %2759 = vpow2.f32 %v2493_v30 }
 0xac8   :  { %v1611_v31 = vpop.f32.mrf.mxu2 }
 0xac9   :  { %v1639_v49 = vadd.f32 %v1638_v48, %v1611_v31 }
 0xaca   :  { %v1584_v32 = vpop.f32.mrf.mxu1 }
 0xacb   :  { %v2494_v50 = vmul.f32 -1.442695, %v1639_v49 }
 0xacd   :  { %v2760_v33 = vpop.eup %2759 }
 0xace   :  { %v1621_v34 = vadd.f32 1.0, %v2760_v33 }
 0xad0   :  { %2761 = vrcp.f32 %v1621_v34  ;;  %v1613_v35 = vpop.f32.mrf.mxu2  ;;  %v1633_v39 = vand.u32 2147483648, %v1621_v34  ;;  %v1631_v41 = vand.u32 2147483647, %v1621_v34  ;;  %vm1627_vm6 = vweird.f32 %v1621_v34 }
 0xad1   :  { %2763 = vpow2.f32 %v2494_v50 }
 0xad2   :  { %v1634_v43 = vor.u32 1.1754944e-38, %v1633_v39  ;;  %vm1632_vm8 = vcmp.eq.f32.partialorder %v1631_v41, 8.507059e+37 }
 0xad6   :  { %v2762_v36 = vpop.eup %2761 }
 0xad7   :  { %v1623_v37 = vmul.f32 %v2762_v36, %v1621_v34  ;;  %vm1628_vm5 = vweird.f32 %v2762_v36  ;;  %v2764_v51 = vpop.eup %2763 }
 0xad8   :  { %vm1629_vm7 = vmor %vm1627_vm6, %vm1628_vm5  ;;  %v1643_v52 = vadd.f32 1.0, %v2764_v51 }
 0xad9   :  { %v1624_v38 = vsub.f32 1.0, %v1623_v37 }
 0xada   :  { %2765 = vrcp.f32 %v1643_v52  ;;  %v1655_v58 = vand.u32 2147483648, %v1643_v52  ;;  %vm1649_vm10 = vweird.f32 %v1643_v52  ;;  %v1653_v59 = vand.u32 2147483647, %v1643_v52 }
 0xadb   :  { %v1625_v40 = vmul.f32 %v2762_v36, %v1624_v38 }
 0xadc   :  { %v1656_v0 = vor.u32 1.1754944e-38, %v1655_v58  ;;  %vm1654_vm12 = vcmp.eq.f32.partialorder %v1653_v59, 8.507059e+37 }
 0xadd   :  { %v1626_v42 = vadd.f32 %v2762_v36, %v1625_v40 }
 0xadf   :  { %v1630_v44 = vsel %vm1629_vm7, %v2762_v36, %v1626_v42 }
 0xae0   :  { %v1635_v45 = vsel %vm1632_vm8, %v1634_v43, %v1630_v44  ;;  %v2766_v53 = vpop.eup %2765 }
 0xae1   :  { %v1661_v46 = vmul.f32 %v1635_v45, %v3424_v17  ;;  %v1645_v54 = vmul.f32 %v2766_v53, %v1643_v52  ;;  %vm1650_vm9 = vweird.f32 %v2766_v53  ;;  %v1840_v45 = vld [vmem:[#allocation4 + $0x30] sm:$0xff] }
 0xae2   :  { %vm1651_vm11 = vmor %vm1649_vm10, %vm1650_vm9 }
 0xae3   :  { %v1662_v47 = vpack.c.bf16 %v1661_v46, %v1661_v46  ;;  %v1646_v55 = vsub.f32 1.0, %v1645_v54 }
 0xae5   :  { %2503 = vmatmul.msk.bf16.vlgmr.msra.gmra.mxu3 %vm334_vm2, %v1662_v47  ;;  %v1647_v56 = vmul.f32 %v2766_v53, %v1646_v55 }
 0xae7   :  { %v1648_v57 = vadd.f32 %v2766_v53, %v1647_v56 }
 0xae9   :  { %v1652_v63 = vsel %vm1651_vm11, %v2766_v53, %v1648_v57  ;;  %v1862_v57 = vld [vmem:[#allocation5 + $0x30] sm:$0xff] }
 0xaea   :  { %v1657_v3 = vsel %vm1654_vm12, %v1656_v0, %v1652_v63 }
 0xaeb   :  { %v1698_v4 = vsub.f32 1.0, %v1657_v3  ;;  %v1697_v7 = vmul.f32 %v1657_v3, %v3424_v17  ;;  %v2679_v17 = vld [vmem:[#allocation20 + $0x8] sm:$0xff] }
 0xaec   :  { %1890 = vmatpush.bf16.msrb.mxu3 %v2679_v17  ;;  %v2020_v17 = vld [vmem:[#allocation3 + $0x38] sm:$0xff] }
 0xaf0   :  { %1891 = vmatpush.bf16.msrb.mxu3 %v2678_v24 }
 0xb68   :  { %v1691_v61 = vpop.f32.mrf.mxu3 }
 0xb69   :  { %v1695_v62 = vadd.f32 %v1691_v61, %v1660_v60 }
 0xb6b   :  { %2767 = vtanh.f32 %v1695_v62 }
 0xb70   :  { %v1693_v5 = vpop.f32.mrf.mxu3 }
 0xb71   :  { %v2768_v6 = vpop.eup %2767 }
 0xb72   :  { %v1699_v8 = vmul.f32 %v2768_v6, %v1698_v4 }
 0xb74   :  { %v3436_v9 = vadd.f32 %v1699_v8, %v1697_v7 }
 0xb76   :  { %v1701_v10 = vpack.c.bf16 %v3436_v9, %v3436_v9  ;;  %v1704_v11 = vmax.f32 %v3414_v14, %v3436_v9  ;;  %v2684_v14 = vld [vmem:[%s3502_s9] sm:$0xff] }
 0xb77   :  { %v2686_v9 = vld [vmem:[#allocation18] sm:$0xff]  ;;  %1984 = vmatpush.bf16.msra.mxu1 %v2684_v14 }
 0xb78   :  { %1703 = vst.msk [vmem:[#allocation2 + $0x14] sm:$0xf] %vm285_vm1, %v1701_v10  ;;  %2013 = vmatpush.bf16.msra.mxu2 %v2686_v9 }
 0xb7f   :  { %v2672_v12 = vld [vmem:[#allocation2 + $0x10] sm:$0xff] }
 0xb80   :  { %1747 = vmatpush.bf16.msrb.mxu0 %v2672_v12  ;;  %v2682_v12 = vld [vmem:[#allocation2 + $0x10] sm:$0xff] }
 0xb84   :  { %1748 = vmatpush.bf16.msrb.mxu0 %v2671_v13  ;;  %v2681_v13 = vld [vmem:[#allocation2 + $0x8] sm:$0xff] }
 0xb88   :  { %1749 = vmatpush.bf16.msrb.mxu0 %v2670_v16  ;;  %v2680_v16 = vld [vmem:[#allocation2] sm:$0xff] }
 0xb8b   :  { %2521 = vmatmul.msk.bf16.vlgmr.msrb.gmra.mxu0 %vm531_vm3, %v2504_v18  ;;  %v2551_v18 = vld [vmem:[%s3494_s1 + $0x1c] sm:$0xf] }
 0xc08   :  { %v3450_v23 = vpop.f32.mrf.mxu0 }
 0xc09   :  { %v1755_v20 = vpack.c.bf16 %v3450_v23, %v3450_v23 }
 0xc0b   :  { %2530 = vmatmul.msk.bf16.vlgmr.msrb.gmra.mxu1 %vm334_vm2, %v1755_v20  ;;  %2539 = vmatmul.msk.bf16.vlgmr.msrb.gmra.mxu2 %vm334_vm2, %v1755_v20  ;;  %v2688_v20 = vld [vmem:[#allocation20] sm:$0xff] }
 0xc10   :  { %v1753_v15 = vpop.f32.mrf.mxu0 }
 0xc88   :  { %v1784_v26 = vpop.f32.mrf.mxu1 }
 0xc89   :  { %v1819_v25 = vadd.f32 %v1818_v27, %v1784_v26 }
 0xc8b   :  { %v2540_v21 = vmul.f32 -1.442695, %v1819_v25 }
 0xc8d   :  { %2769 = vpow2.f32 %v2540_v21 }
 0xc8e   :  { %v1813_v28 = vpop.f32.mrf.mxu2 }
 0xc8f   :  { %v1841_v46 = vadd.f32 %v1840_v45, %v1813_v28 }
 0xc90   :  { %v1786_v29 = vpop.f32.mrf.mxu1 }
 0xc91   :  { %v2541_v47 = vmul.f32 -1.442695, %v1841_v46 }
 0xc93   :  { %v2770_v30 = vpop.eup %2769 }
 0xc94   :  { %v1823_v31 = vadd.f32 1.0, %v2770_v30 }
 0xc96   :  { %2771 = vrcp.f32 %v1823_v31  ;;  %v1815_v32 = vpop.f32.mrf.mxu2  ;;  %v1835_v36 = vand.u32 2147483648, %v1823_v31  ;;  %v1833_v38 = vand.u32 2147483647, %v1823_v31  ;;  %vm1829_vm14 = vweird.f32 %v1823_v31 }
 0xc97   :  { %2773 = vpow2.f32 %v2541_v47  ;;  %v2112_v47 = vld [vmem:[#allocation21 + $0x18] sm:$0xff] }
 0xc98   :  { %v1836_v40 = vor.u32 1.1754944e-38, %v1835_v36  ;;  %vm1834_vm0 = vcmp.eq.f32.partialorder %v1833_v38, 8.507059e+37 }
 0xc9c   :  { %v2772_v33 = vpop.eup %2771 }
 0xc9d   :  { %v1825_v34 = vmul.f32 %v2772_v33, %v1823_v31  ;;  %vm1830_vm13 = vweird.f32 %v2772_v33  ;;  %v2774_v48 = vpop.eup %2773 }
 0xc9e   :  { %vm1831_vm15 = vmor %vm1829_vm14, %vm1830_vm13  ;;  %v1845_v49 = vadd.f32 1.0, %v2774_v48  ;;  %v2111_v48 = vld [vmem:[#allocation21 + $0x10] sm:$0xff] }
 0xc9f   :  { %v1826_v35 = vsub.f32 1.0, %v1825_v34 }
 0xca0   :  { %2775 = vrcp.f32 %v1845_v49  ;;  %v1857_v55 = vand.u32 2147483648, %v1845_v49  ;;  %vm1851_vm5 = vweird.f32 %v1845_v49  ;;  %v1855_v56 = vand.u32 2147483647, %v1845_v49 }
 0xca1   :  { %v1827_v37 = vmul.f32 %v2772_v33, %v1826_v35 }
 0xca2   :  { %v1858_v61 = vor.u32 1.1754944e-38, %v1857_v55  ;;  %vm1856_vm7 = vcmp.eq.f32.partialorder %v1855_v56, 8.507059e+37 }
 0xca3   :  { %v1828_v39 = vadd.f32 %v2772_v33, %v1827_v37 }
 0xca5   :  { %v1832_v41 = vsel %vm1831_vm15, %v2772_v33, %v1828_v39 }
 0xca6   :  { %v1837_v42 = vsel %vm1834_vm0, %v1836_v40, %v1832_v41  ;;  %v2776_v50 = vpop.eup %2775 }
 0xca7   :  { %v1863_v43 = vmul.f32 %v1837_v42, %v3450_v23  ;;  %v1847_v51 = vmul.f32 %v2776_v50, %v1845_v49  ;;  %vm1852_vm4 = vweird.f32 %v2776_v50  ;;  %v2042_v42 = vld [vmem:[#allocation4 + $0x38] sm:$0xff]  ;;  %v2110_v49 = vld [vmem:[#allocation21 + $0x8] sm:$0xff] }
 0xca8   :  { %vm1853_vm6 = vmor %vm1851_vm5, %vm1852_vm4 }
 0xca9   :  { %v1864_v44 = vpack.c.bf16 %v1863_v43, %v1863_v43  ;;  %v1848_v52 = vsub.f32 1.0, %v1847_v51  ;;  %v2109_v51 = vld [vmem:[#allocation21] sm:$0xff] }
 0xcab   :  { %2550 = vmatmul.msk.bf16.vlgmr.msrb.gmra.mxu3 %vm334_vm2, %v1864_v44  ;;  %v1849_v53 = vmul.f32 %v2776_v50, %v1848_v52 }
 0xcad   :  { %v1850_v54 = vadd.f32 %v2776_v50, %v1849_v53 }
 0xcaf   :  { %v1854_v60 = vsel %vm1853_vm6, %v2776_v50, %v1850_v54 }
 0xcb0   :  { %v1859_v62 = vsel %vm1856_vm7, %v1858_v61, %v1854_v60 }
 0xcb1   :  { %v1900_v63 = vsub.f32 1.0, %v1859_v62  ;;  %v1899_v4 = vmul.f32 %v1859_v62, %v3450_v23  ;;  %v2689_v23 = vld [vmem:[#allocation20 + $0x8] sm:$0xff] }
 0xcb2   :  { %2092 = vmatpush.bf16.msra.mxu3 %v2689_v23 }
 0xcb6   :  { %2093 = vmatpush.bf16.msra.mxu3 %v2688_v20 }
 0xd2e   :  { %v1893_v58 = vpop.f32.mrf.mxu3 }
 0xd2f   :  { %v1897_v59 = vadd.f32 %v1893_v58, %v1862_v57  ;;  %v2064_v58 = vld [vmem:[#allocation5 + $0x38] sm:$0xff] }
 0xd31   :  { %2777 = vtanh.f32 %v1897_v59 }
 0xd36   :  { %v1895_v0 = vpop.f32.mrf.mxu3 }
 0xd37   :  { %v2778_v3 = vpop.eup %2777 }
 0xd38   :  { %v1901_v5 = vmul.f32 %v2778_v3, %v1900_v63 }
 0xd3a   :  { %v1902_v6 = vadd.f32 %v1901_v5, %v1899_v4 }
 0xd3c   :  { %v1903_v7 = vpack.c.bf16 %v1902_v6, %v1902_v6  ;;  %v3465_v8 = vmax.f32 %v1704_v11, %v1902_v6 }
 0xd3e   :  { %1905 = vst.msk [vmem:[#allocation2 + $0x18] sm:$0xf] %vm285_vm1, %v1903_v7 }
 0xd45   :  { %v2683_v10 = vld [vmem:[#allocation2 + $0x18] sm:$0xff] }
 0xd46   :  { %1948 = vmatpush.bf16.msra.mxu0 %v2683_v10  ;;  %v2708_v10 = vld [vmem:[%s3506_s13] ss:$0 sm:$0xff] }
 0xd4a   :  { %1949 = vmatpush.bf16.msra.mxu0 %v2682_v12 }
 0xd4e   :  { %1950 = vmatpush.bf16.msra.mxu0 %v2681_v13 }
 0xd52   :  { %1951 = vmatpush.bf16.msra.mxu0 %v2680_v16 }
 0xd55   :  { %2568 = vmatmul.msk.bf16.vlgmr.msra.gmra.mxu0 %vm531_vm3, %v2551_v18 }
 0xd56   :  { %2132 = vmatpush.msrb.mxu0 %v2112_v47 }
 0xd58   :  { %2133 = vmatpush.msrb.mxu0 %v2111_v48 }
 0xd5a   :  { %2134 = vmatpush.msrb.mxu0 %v2110_v49 }
 0xd5c   :  { %2135 = vmatpush.msrb.mxu0 %v2109_v51 }
 0xdd2   :  { %v3475_v11 = vpop.f32.mrf.mxu0 }
 0xdd3   :  { %v1957_v19 = vpack.c.bf16 %v3475_v11, %v3475_v11 }
 0xdd5   :  { %2577 = vmatmul.msk.bf16.vlgmr.msra.gmra.mxu1 %vm334_vm2, %v1957_v19  ;;  %2586 = vmatmul.msk.bf16.vlgmr.msra.gmra.mxu2 %vm334_vm2, %v1957_v19 }
 0xdda   :  { %v1955_v22 = vpop.f32.mrf.mxu0 }
 0xe52   :  { %v1986_v15 = vpop.f32.mrf.mxu1 }
 0xe53   :  { %v2021_v24 = vadd.f32 %v2020_v17, %v1986_v15 }
 0xe55   :  { %v2587_v26 = vmul.f32 -1.442695, %v2021_v24 }
 0xe57   :  { %2779 = vpow2.f32 %v2587_v26 }
 0xe58   :  { %v2015_v27 = vpop.f32.mrf.mxu2 }
 0xe59   :  { %v2043_v43 = vadd.f32 %v2042_v42, %v2015_v27 }
 0xe5a   :  { %v1988_v25 = vpop.f32.mrf.mxu1 }
 0xe5b   :  { %v2588_v44 = vmul.f32 -1.442695, %v2043_v43 }
 0xe5d   :  { %v2780_v21 = vpop.eup %2779 }
 0xe5e   :  { %v2025_v28 = vadd.f32 1.0, %v2780_v21 }
 0xe60   :  { %2781 = vrcp.f32 %v2025_v28  ;;  %v2017_v29 = vpop.f32.mrf.mxu2  ;;  %v2037_v33 = vand.u32 2147483648, %v2025_v28  ;;  %v2035_v35 = vand.u32 2147483647, %v2025_v28  ;;  %vm2031_vm8 = vweird.f32 %v2025_v28 }
 0xe61   :  { %2783 = vpow2.f32 %v2588_v44 }
 0xe62   :  { %v2038_v37 = vor.u32 1.1754944e-38, %v2037_v33  ;;  %vm2036_vm10 = vcmp.eq.f32.partialorder %v2035_v35, 8.507059e+37 }
 0xe66   :  { %v2782_v30 = vpop.eup %2781 }
 0xe67   :  { %v2027_v31 = vmul.f32 %v2782_v30, %v2025_v28  ;;  %vm2032_vm3 = vweird.f32 %v2782_v30  ;;  %v2784_v45 = vpop.eup %2783 }
 0xe68   :  { %vm2033_vm9 = vmor %vm2031_vm8, %vm2032_vm3  ;;  %v2047_v46 = vadd.f32 1.0, %v2784_v45 }
 0xe69   :  { %v2028_v32 = vsub.f32 1.0, %v2027_v31 }
 0xe6a   :  { %2785 = vrcp.f32 %v2047_v46  ;;  %v2059_v56 = vand.u32 2147483648, %v2047_v46  ;;  %vm2053_vm12 = vweird.f32 %v2047_v46  ;;  %v2057_v57 = vand.u32 2147483647, %v2047_v46 }
 0xe6b   :  { %v2029_v34 = vmul.f32 %v2782_v30, %v2028_v32 }
 0xe6c   :  { %v2060_v62 = vor.u32 1.1754944e-38, %v2059_v56  ;;  %vm2058_vm14 = vcmp.eq.f32.partialorder %v2057_v57, 8.507059e+37 }
 0xe6d   :  { %v2030_v36 = vadd.f32 %v2782_v30, %v2029_v34 }
 0xe6f   :  { %v2034_v38 = vsel %vm2033_vm9, %v2782_v30, %v2030_v36 }
 0xe70   :  { %v2039_v39 = vsel %vm2036_vm10, %v2038_v37, %v2034_v38  ;;  %v2786_v50 = vpop.eup %2785 }
 0xe71   :  { %v2065_v40 = vmul.f32 %v2039_v39, %v3475_v11  ;;  %v2049_v52 = vmul.f32 %v2786_v50, %v2047_v46  ;;  %vm2054_vm11 = vweird.f32 %v2786_v50 }
 0xe72   :  { %vm2055_vm13 = vmor %vm2053_vm12, %vm2054_vm11 }
 0xe73   :  { %v2066_v41 = vpack.c.bf16 %v2065_v40, %v2065_v40  ;;  %v2050_v53 = vsub.f32 1.0, %v2049_v52 }
 0xe75   :  { %2597 = vmatmul.msk.bf16.vlgmr.msra.gmra.mxu3 %vm334_vm2, %v2066_v41  ;;  %v2051_v54 = vmul.f32 %v2786_v50, %v2050_v53 }
 0xe77   :  { %v2052_v55 = vadd.f32 %v2786_v50, %v2051_v54 }
 0xe79   :  { %v2056_v61 = vsel %vm2055_vm13, %v2786_v50, %v2052_v55 }
 0xe7a   :  { %v2061_v63 = vsel %vm2058_vm14, %v2060_v62, %v2056_v61 }
 0xe7b   :  { %v2102_v0 = vsub.f32 1.0, %v2061_v63  ;;  %v2101_v3 = vmul.f32 %v2061_v63, %v3475_v11 }
 0xef8   :  { %v2095_v59 = vpop.f32.mrf.mxu3 }
 0xef9   :  { %v2099_v60 = vadd.f32 %v2095_v59, %v2064_v58 }
 0xefb   :  { %2787 = vtanh.f32 %v2099_v60 }
 0xf00   :  { %v2097_v1 = vpop.f32.mrf.mxu3 }
 0xf01   :  { %v2788_v2 = vpop.eup %2787 }
 0xf02   :  { %v2103_v4 = vmul.f32 %v2788_v2, %v2102_v0 }
 0xf04   :  { %v2104_v5 = vadd.f32 %v2103_v4, %v2101_v3 }
 0xf06   :  { %v2105_v6 = vpack.c.bf16 %v2104_v5, %v2104_v5  ;;  %v2108_v7 = vmax.f32 %v3465_v8, %v2104_v5 }
 0xf08   :  { %2107 = vst.msk [vmem:[#allocation2 + $0x1c] sm:$0xf] %vm285_vm1, %v2105_v6  ;;  %2598 = vmatmul.msk.f32.vlgmr.msrb.gmra.mxu0 %vm334_vm2, %v2108_v7 }
 0xf85   :  { %v2137_v12 = vpop.f32.mrf.mxu0 }
 0xf86   :  { %v2138_v13 = vadd.f32 %v2708_v10, %v2137_v12 }
 0xf88   :  { %2140 = vst [vmem:[#allocation23] sm:$0xff] %v2138_v13 }
 0xf89   :  { %2151 = dma.vmem_to_hbm [thread:$0]  %s2147_s2, 128, %s2149_s5, [#allocation8]  }
 0xf8a   :  { %3065 = dma.done.wait [#allocation8], 128  }
 0xf8b   :  { %3066 = vsyncadd [#allocation8], 4294967168 }
 0xf8c   :  { %2156 = vsyncpa [#allocation7], 1 }
 0xf8d   :  { %2157 = vsyncpa [#allocation10], 1 }
 0xf8e   :  { %2158 = vsyncpa [#allocation13], 1 }
 0xf8f   :  { %2159 = vsyncpa [#allocation16], 1 }
 0xf90   :  { %2160 = vsyncpa [#allocation19], 1 }
 0xf91   :  { %2161 = vsyncpa [#allocation22], 1 }
 0xf92   :  { %2162 = vsyncpa [#allocation8], 1 }

</bundles_post_ra>
